<compile_context>
chip_gen: v7x
topology: tpu7x:2x2x1
jax: 0.10.0
libtpu: 0.0.40
codegen_flags: <defaults>
</compile_context>

<pallas_src>
import functools

import jax
import jax.numpy as jnp
from jax import lax
from jax.experimental import pallas as pl
from jax.experimental.pallas import tpu as pltpu


LANE = 128      # lane width (last dim)
SUBLANE = 8     # sublane width (second-to-last dim)


# ----------------------------------------------------------------------------
# Fused Pallas kernel: spatial L2 norms + avg pool + norm_scale + fc
# ----------------------------------------------------------------------------
def _fused_norm_scale_fc_kernel(t_ref, h1_ref, h2_ref, w_ref, b_ref, out_ref):
    # h1_ref / h2_ref: (Np, C, HW) f32 — feature maps after layer4[0] / layer4[1]
    h1 = h1_ref[...]
    h2 = h2_ref[...]

    # norm_k = mean over channels of the per-channel spatial L2 norm
    # (torch.norm(x, p=2, dim=[2,3]).mean(dim=1, keepdim=True))
    n1 = jnp.mean(jnp.sqrt(jnp.sum(h1 * h1, axis=-1)), axis=-1, keepdims=True)  # (Np, 1)
    n2 = jnp.mean(jnp.sqrt(jnp.sum(h2 * h2, axis=-1)), axis=-1, keepdims=True)  # (Np, 1)

    # adaptive_avg_pool2d(x, [1, 1]) -> spatial mean
    feat = jnp.mean(h2, axis=-1)                                                 # (Np, C)

    # features / norm2 * (norm2 - t * (norm2 - norm1)), divide hoisted to one
    # EUP reciprocal per row (EUP slot is free relative to the VPU).
    t = t_ref[0]
    scale = (n2 - t * (n2 - n1)) * pl.reciprocal(n2, approx=True)                # (Np, 1)

    # logits = scaled_features @ W^T + b (W pre-transposed & zero-padded to 128)
    out_ref[...] = (
        jnp.dot(feat * scale, w_ref[...], preferred_element_type=jnp.float32)
        + b_ref[...]
    )


def norm_evaluater_head(h_pre, h_post, norm_temperature, fc_w_t, fc_b):
    """h_pre/h_post: (N, C, H, W) f32 -> logits (N, num_classes) f32."""
    N, C, H, W = h_post.shape
    HW = H * W
    K = fc_w_t.shape[1]

    Np = max(SUBLANE, ((N + SUBLANE - 1) // SUBLANE) * SUBLANE)   # sublane-dense batch
    Kp = max(LANE, ((K + LANE - 1) // LANE) * LANE)               # lane-dense logits

    h1 = h_pre.reshape(N, C, HW).astype(jnp.float32)
    h2 = h_post.reshape(N, C, HW).astype(jnp.float32)
    if Np != N:
        # pad batch rows with ones so padded rows stay finite (sliced off below)
        pad = ((0, Np - N), (0, 0), (0, 0))
        h1 = jnp.pad(h1, pad, constant_values=1.0)
        h2 = jnp.pad(h2, pad, constant_values=1.0)

    w = jnp.zeros((C, Kp), jnp.float32).at[:, :K].set(fc_w_t.astype(jnp.float32))
    b = jnp.zeros((1, Kp), jnp.float32).at[:, :K].set(
        fc_b.astype(jnp.float32).reshape(1, K))

    flops = 4 * Np * C * HW + 2 * Np * C * Kp + 4 * Np * (C + 1)
    transcendentals = 2 * Np * C + Np                      # sqrt + reciprocal
    bytes_accessed = 4 * (2 * Np * C * HW + C * Kp + Kp + Np * Kp + 1)

    logits_p = pl.pallas_call(
        _fused_norm_scale_fc_kernel,
        out_shape=jax.ShapeDtypeStruct((Np, Kp), jnp.float32),
        grid=(1,),
        in_specs=[
            pl.BlockSpec(memory_space=pltpu.MemorySpace.SMEM),   # norm_temperature
            pl.BlockSpec((Np, C, HW), lambda i: (0, 0, 0)),      # h after layer4[0]
            pl.BlockSpec((Np, C, HW), lambda i: (0, 0, 0)),      # h after layer4[1]
            pl.BlockSpec((C, Kp), lambda i: (0, 0)),             # fc weight (padded)
            pl.BlockSpec((1, Kp), lambda i: (0, 0)),             # fc bias (padded)
        ],
        out_specs=pl.BlockSpec((Np, Kp), lambda i: (0, 0)),
        compiler_params=pltpu.CompilerParams(
            dimension_semantics=("arbitrary",)),
        cost_estimate=pl.CostEstimate(
            flops=flops,
            transcendentals=transcendentals,
            bytes_accessed=bytes_accessed),
    )(norm_temperature.astype(jnp.float32), h1, h2, w, b)

    return logits_p[:N, :K]


# ----------------------------------------------------------------------------
# Plain-JAX synthetic backbone (glue): conv1/bn1/act1/maxpool/layer1..4
# ----------------------------------------------------------------------------
def conv2d(x, w, stride=1, padding=1):
    # x: NCHW, w: OIHW
    return lax.conv_general_dilated(
        x, w,
        window_strides=(stride, stride),
        padding=[(padding, padding), (padding, padding)],
        dimension_numbers=("NCHW", "OIHW", "NCHW"),
    )


def batchnorm(x, gamma, beta, eps=1e-5):
    # inference-mode BN with running_mean=0, running_var=1
    g = gamma.reshape(1, -1, 1, 1)
    b = beta.reshape(1, -1, 1, 1)
    return x * g / jnp.sqrt(1.0 + eps) + b


def maxpool_3x3_s2(x):
    return lax.reduce_window(
        x, -jnp.inf, lax.max,
        window_dimensions=(1, 1, 3, 3),
        window_strides=(1, 1, 2, 2),
        padding=((0, 0), (0, 0), (1, 1), (1, 1)),
    )


def basic_block(x, w, gamma, beta):
    # residual block (channel-preserving, stride 1): relu(bn(conv(x)) + x)
    y = conv2d(x, w, stride=1, padding=1)
    y = batchnorm(y, gamma, beta)
    return jax.nn.relu(y + x)


def make_params(key, ndim=32, num_classes=10):
    ks = jax.random.split(key, 16)
    s = 0.1
    p = {}
    p["conv1_w"] = s * jax.random.normal(ks[0], (8, 3, 3, 3), jnp.float32)
    p["bn1_g"] = 1.0 + 0.01 * jax.random.normal(ks[1], (8,), jnp.float32)
    p["bn1_b"] = 0.01 * jax.random.normal(ks[2], (8,), jnp.float32)
    p["l1_w"] = s * jax.random.normal(ks[3], (16, 8, 3, 3), jnp.float32)
    p["l1_g"] = 1.0 + 0.01 * jax.random.normal(ks[4], (16,), jnp.float32)
    p["l1_b"] = 0.01 * jax.random.normal(ks[5], (16,), jnp.float32)
    p["l2_w"] = s * jax.random.normal(ks[6], (32, 16, 3, 3), jnp.float32)
    p["l2_g"] = 1.0 + 0.01 * jax.random.normal(ks[7], (32,), jnp.float32)
    p["l2_b"] = 0.01 * jax.random.normal(ks[8], (32,), jnp.float32)
    p["l3_w"] = s * jax.random.normal(ks[9], (32, 32, 3, 3), jnp.float32)
    p["l3_g"] = 1.0 + 0.01 * jax.random.normal(ks[10], (32,), jnp.float32)
    p["l3_b"] = 0.01 * jax.random.normal(ks[11], (32,), jnp.float32)
    p["l4_0_w"] = s * jax.random.normal(ks[12], (ndim, 32, 3, 3), jnp.float32)
    p["l4_0_g"] = jnp.ones((ndim,), jnp.float32)
    p["l4_0_b"] = jnp.zeros((ndim,), jnp.float32)
    p["l4_1_w"] = s * jax.random.normal(ks[13], (ndim, ndim, 3, 3), jnp.float32)
    p["l4_1_g"] = jnp.ones((ndim,), jnp.float32)
    p["l4_1_b"] = jnp.zeros((ndim,), jnp.float32)
    # fc: PyTorch Linear(ndim, num_classes): W (num_classes, ndim), b (num_classes,)
    # store W pre-transposed as (ndim, num_classes) for the kernel matmul
    p["fc_w_t"] = s * jax.random.normal(ks[14], (ndim, num_classes), jnp.float32)
    p["fc_b"] = 0.01 * jax.random.normal(ks[15], (num_classes,), jnp.float32)
    # temperature parameters (nn.Parameter(torch.ones(1) * 1.5))
    p["base_temperature"] = jnp.full((1,), 1.5, jnp.float32)
    p["norm_temperature"] = jnp.full((1,), 1.5, jnp.float32)
    return p


@functools.partial(jax.jit, static_argnames=("ndim",))
def norm_evaluater_forward(params, x, ndim=32):
    p = params
    # ---- backbone (plain-JAX glue, stands in for self.model.*) ----
    h = conv2d(x, p["conv1_w"], stride=1, padding=1)          # (N, 8, 16, 16)
    h = batchnorm(h, p["bn1_g"], p["bn1_b"])
    h = jax.nn.relu(h)                                        # act1
    h = maxpool_3x3_s2(h)                                     # (N, 8, 8, 8)
    h = jax.nn.relu(batchnorm(conv2d(h, p["l1_w"], 1, 1), p["l1_g"], p["l1_b"]))  # layer1
    h = jax.nn.relu(batchnorm(conv2d(h, p["l2_w"], 2, 1), p["l2_g"], p["l2_b"]))  # layer2
    h = jax.nn.relu(batchnorm(conv2d(h, p["l3_w"], 1, 1), p["l3_g"], p["l3_b"]))  # layer3
    h_pre = basic_block(h, p["l4_0_w"], p["l4_0_g"], p["l4_0_b"])      # layer4[0] -> (N, ndim, 4, 4)
    h_post = basic_block(h_pre, p["l4_1_w"], p["l4_1_g"], p["l4_1_b"])  # layer4[1]

    # ---- Pallas hot path: one fused kernel (norm1, norm2, pool, scale, fc) ----
    logits = norm_evaluater_head(
        h_pre, h_post, p["norm_temperature"], p["fc_w_t"], p["fc_b"]
    )                                                          # (N, num_classes)
    return logits


if __name__ == "__main__":
    key = jax.random.PRNGKey(0)
    k_params, k_input = jax.random.split(key)

    ndim = 32
    num_classes = 10
    params = make_params(k_params, ndim=ndim, num_classes=num_classes)

    # small image batch, NCHW (PyTorch convention)
    x = jax.random.normal(k_input, (2, 3, 16, 16), jnp.float32)

    logits = norm_evaluater_forward(params, x, ndim=ndim)
    jax.block_until_ready(logits)

    assert logits.shape == (2, num_classes)
    assert logits.dtype == jnp.float32
    assert bool(jnp.all(jnp.isfinite(logits)))
    print("KERNEL_OK")
</pallas_src>

<mosaic_0001>
module attributes {stable_mosaic.version = 11 : i64} {
  func.func @_fused_norm_scale_fc_kernel(%arg0: i32, %arg1: memref<1xf32, #tpu.memory_space<smem>>, %arg2: memref<8x32x16xf32, #tpu.memory_space<vmem>>, %arg3: memref<8x32x16xf32, #tpu.memory_space<vmem>>, %arg4: memref<32x128xf32, #tpu.memory_space<vmem>>, %arg5: memref<1x128xf32, #tpu.memory_space<vmem>>, %arg6: memref<8x128xf32, #tpu.memory_space<vmem>>) attributes {dimension_semantics = [#tpu.dimension_semantics<arbitrary>], iteration_bounds = array<i64: 1>, scalar_prefetch = 0 : i64, scratch_operands = 0 : i64, tpu.core_type = #tpu.core_type<tc>, window_params = [{transform_indices = @transform_0, window_bounds = array<i64: 1>}, {pipeline_mode = #tpu.pipeline_mode<synchronous>, transform_indices = @transform_1, window_bounds = array<i64: 8, 32, 16>}, {pipeline_mode = #tpu.pipeline_mode<synchronous>, transform_indices = @transform_2, window_bounds = array<i64: 8, 32, 16>}, {pipeline_mode = #tpu.pipeline_mode<synchronous>, transform_indices = @transform_3, window_bounds = array<i64: 32, 128>}, {pipeline_mode = #tpu.pipeline_mode<synchronous>, transform_indices = @transform_4, window_bounds = array<i64: 1, 128>}, {pipeline_mode = #tpu.pipeline_mode<synchronous>, transform_indices = @transform_5, window_bounds = array<i64: 8, 128>}]} {
    %c0 = arith.constant 0 : index
    %c0_0 = arith.constant 0 : index
    %c0_1 = arith.constant 0 : index
    %0 = vector.load %arg2[%c0, %c0_0, %c0_1] : memref<8x32x16xf32, #tpu.memory_space<vmem>>, vector<8x32x16xf32>
    %c0_2 = arith.constant 0 : index
    %c0_3 = arith.constant 0 : index
    %c0_4 = arith.constant 0 : index
    %1 = vector.load %arg3[%c0_2, %c0_3, %c0_4] : memref<8x32x16xf32, #tpu.memory_space<vmem>>, vector<8x32x16xf32>
    %2 = arith.mulf %0, %0 : vector<8x32x16xf32>
    %cst = arith.constant dense<0.000000e+00> : vector<8x32xf32>
    %3 = vector.multi_reduction <add>, %2, %cst [2] : vector<8x32x16xf32> to vector<8x32xf32>
    %4 = math.sqrt %3 : vector<8x32xf32>
    %cst_5 = arith.constant dense<0.000000e+00> : vector<8xf32>
    %5 = vector.multi_reduction <add>, %4, %cst_5 [1] : vector<8x32xf32> to vector<8xf32>
    %6 = vector.shape_cast %5 : vector<8xf32> to vector<8x1xf32>
    %cst_6 = arith.constant 3.200000e+01 : f32
    %7 = vector.broadcast %cst_6 : f32 to vector<8x1xf32>
    %8 = arith.divf %6, %7 : vector<8x1xf32>
    %9 = arith.mulf %1, %1 : vector<8x32x16xf32>
    %cst_7 = arith.constant dense<0.000000e+00> : vector<8x32xf32>
    %10 = vector.multi_reduction <add>, %9, %cst_7 [2] : vector<8x32x16xf32> to vector<8x32xf32>
    %11 = math.sqrt %10 : vector<8x32xf32>
    %cst_8 = arith.constant dense<0.000000e+00> : vector<8xf32>
    %12 = vector.multi_reduction <add>, %11, %cst_8 [1] : vector<8x32xf32> to vector<8xf32>
    %13 = vector.shape_cast %12 : vector<8xf32> to vector<8x1xf32>
    %cst_9 = arith.constant 3.200000e+01 : f32
    %14 = vector.broadcast %cst_9 : f32 to vector<8x1xf32>
    %15 = arith.divf %13, %14 : vector<8x1xf32>
    %cst_10 = arith.constant dense<0.000000e+00> : vector<8x32xf32>
    %16 = vector.multi_reduction <add>, %1, %cst_10 [2] : vector<8x32x16xf32> to vector<8x32xf32>
    %cst_11 = arith.constant 1.600000e+01 : f32
    %17 = vector.broadcast %cst_11 : f32 to vector<8x32xf32>
    %18 = arith.divf %16, %17 : vector<8x32xf32>
    %c0_12 = arith.constant 0 : index
    %19 = memref.load %arg1[%c0_12] : memref<1xf32, #tpu.memory_space<smem>>
    %20 = arith.subf %15, %8 : vector<8x1xf32>
    %21 = vector.broadcast %19 : f32 to vector<8x1xf32>
    %22 = arith.mulf %21, %20 : vector<8x1xf32>
    %23 = arith.subf %15, %22 : vector<8x1xf32>
    %24 = tpu.reciprocal %15 {approx = true} : vector<8x1xf32> -> vector<8x1xf32>
    %25 = arith.mulf %23, %24 : vector<8x1xf32>
    %26 = vector.broadcast %25 : vector<8x1xf32> to vector<8x32xf32>
    %27 = arith.mulf %18, %26 : vector<8x32xf32>
    %c0_13 = arith.constant 0 : index
    %c0_14 = arith.constant 0 : index
    %28 = vector.load %arg4[%c0_13, %c0_14] : memref<32x128xf32, #tpu.memory_space<vmem>>, vector<32x128xf32>
    %cst_15 = arith.constant dense<0.000000e+00> : vector<8x128xf32>
    %29 = tpu.matmul %27, %28, %cst_15 {dimension_numbers = #tpu.dot_dimension_numbers<[1], [0], [0], [1], [0, 0, 1, 1], [], []>} : vector<8x32xf32>, vector<32x128xf32>, vector<8x128xf32> -> vector<8x128xf32>
    %c0_16 = arith.constant 0 : index
    %c0_17 = arith.constant 0 : index
    %30 = vector.load %arg5[%c0_16, %c0_17] : memref<1x128xf32, #tpu.memory_space<vmem>>, vector<1x128xf32>
    %31 = vector.broadcast %30 : vector<1x128xf32> to vector<8x128xf32>
    %32 = arith.addf %29, %31 : vector<8x128xf32>
    %c0_18 = arith.constant 0 : index
    %c0_19 = arith.constant 0 : index
    %33 = vector.load %arg6[%c0_18, %c0_19] : memref<8x128xf32, #tpu.memory_space<vmem>>, vector<8x128xf32>
    tpu.vector_store %arg6[%c0_18, %c0_19], %32 {strides = array<i32>} : memref<8x128xf32, #tpu.memory_space<vmem>>, vector<8x128xf32>,
    return
  }
  func.func @transform_0(%arg0: i32) -> i32 {
    %c0_i32 = arith.constant 0 : i32
    %c0_i32_0 = arith.constant 0 : i32
    return %c0_i32 : i32
  }
  func.func @transform_1(%arg0: i32) -> (i32, i32, i32) {
    %c0_i32 = arith.constant 0 : i32
    %c0_i32_0 = arith.constant 0 : i32
    %c0_i32_1 = arith.constant 0 : i32
    %c0_i32_2 = arith.constant 0 : i32
    return %c0_i32, %c0_i32_0, %c0_i32_1 : i32, i32, i32
  }
  func.func @transform_2(%arg0: i32) -> (i32, i32, i32) {
    %c0_i32 = arith.constant 0 : i32
    %c0_i32_0 = arith.constant 0 : i32
    %c0_i32_1 = arith.constant 0 : i32
    %c0_i32_2 = arith.constant 0 : i32
    return %c0_i32, %c0_i32_0, %c0_i32_1 : i32, i32, i32
  }
  func.func @transform_3(%arg0: i32) -> (i32, i32) {
    %c0_i32 = arith.constant 0 : i32
    %c0_i32_0 = arith.constant 0 : i32
    %c0_i32_1 = arith.constant 0 : i32
    return %c0_i32, %c0_i32_0 : i32, i32
  }
  func.func @transform_4(%arg0: i32) -> (i32, i32) {
    %c0_i32 = arith.constant 0 : i32
    %c0_i32_0 = arith.constant 0 : i32
    %c0_i32_1 = arith.constant 0 : i32
    return %c0_i32, %c0_i32_0 : i32, i32
  }
  func.func @transform_5(%arg0: i32) -> (i32, i32) {
    %c0_i32 = arith.constant 0 : i32
    %c0_i32_0 = arith.constant 0 : i32
    %c0_i32_1 = arith.constant 0 : i32
    return %c0_i32, %c0_i32_0 : i32, i32
  }
}

</mosaic_0001>

<bundles_post_ra>
// kernel: norm_evaluater_forward.1
= control target key start
LH: loop header
LB: loop body
LE: loop exit
PB: predicated region body
PF: predicated region fallthrough
CT: control target
= control target key end

     0   :  { %vm3816_vm0 = vcmask 130048   ;;  %s3810_s2 = inlined_call_operand.vmem [shape: f32[8,32,16], index: 2, kind: input, shape index: {}]   ;;  %s3811_s1 = inlined_call_operand.vmem [shape: f32[8,32,16], index: 1, kind: input, shape index: {}]   ;;  %s3812_s0 = inlined_call_operand.<no memory space> [shape: f32[1], index: 0, kind: input, shape index: {}]   ;;  %s3813_s3 = inlined_call_operand.vmem [shape: f32[32,128], index: 3, kind: input, shape index: {}]   ;;  %s3814_s4 = inlined_call_operand.vmem [shape: f32[1,128], index: 4, kind: input, shape index: {}]   ;;  %s3815_s5 = inlined_call_operand.vmem [shape: f32[8,128], index: 5, kind: output, shape index: {}]  }
   0x1   :  { %v1996_v0 = vld [vmem:[%s3810_s2 + $0x20] sm:$0xff]  ;;  %v2006_v2 = vld [vmem:[%s3810_s2 + $0x28] sm:$0xff]  ;;  %v2024_v8 = vld [vmem:[%s3810_s2 + $0x30] sm:$0xff] }
   0x2   :  { %v2001_v1 = vld [vmem:[%s3810_s2] sm:$0xff]  ;;  %v655_v3 = vmul.f32 %v1996_v0, %v1996_v0  ;;  %v656_v5 = vmul.f32 %v2006_v2, %v2006_v2  ;;  %v2017_v6 = vld [vmem:[%s3810_s2 + $0x8] sm:$0xff]  ;;  %v2029_v9 = vld [vmem:[%s3810_s2 + $0x10] sm:$0xff]  ;;  %v657_v14 = vmul.f32 %v2024_v8, %v2024_v8 }
   0x3   :  { %v651_v4 = vmul.f32 %v2001_v1, %v2001_v1  ;;  %v652_v7 = vmul.f32 %v2017_v6, %v2017_v6  ;;  %v653_v15 = vmul.f32 %v2029_v9, %v2029_v9  ;;  %v2042_v16 = vld [vmem:[%s3810_s2 + $0x48] sm:$0xff]  ;;  %v2047_v17 = vld [vmem:[%s3810_s2 + $0x40] sm:$0xff]  ;;  %v2058_v22 = vld [vmem:[%s3810_s2 + $0x38] sm:$0xff] }
   0x4   :  { %v695_v10 = vsel %vm3816_vm0, %v655_v3, 0.0  ;;  %v698_v12 = vsel %vm3816_vm0, %v656_v5, 0.0  ;;  %v701_v18 = vsel %vm3816_vm0, %v657_v14, 0.0  ;;  %v660_v20 = vmul.f32 %v2042_v16, %v2042_v16  ;;  %v2063_v23 = vld [vmem:[%s3810_s2 + $0x18] sm:$0xff]  ;;  %v65_v28 = vld [vmem:[%s3810_s2 + $0x60] sm:$0xff]  ;;  %v2077_v29 = vld [vmem:[%s3810_s2 + $0x50] sm:$0xff] }
   0x5   :  { %v683_v11 = vsel %vm3816_vm0, %v651_v4, 0.0  ;;  %696 = vadd.xlane.f32.xlu1 %v695_v10  ;;  %v686_v13 = vsel %vm3816_vm0, %v652_v7, 0.0  ;;  %v689_v19 = vsel %vm3816_vm0, %v653_v15, 0.0  ;;  %v659_v21 = vmul.f32 %v2047_v17, %v2047_v17  ;;  %v64_v34 = vld [vmem:[%s3810_s2 + $0x58] sm:$0xff]  ;;  %v2089_v35 = vld [vmem:[%s3810_s2 + $0x68] sm:$0xff]  ;;  %v69_v40 = vld [vmem:[%s3810_s2 + $0x80] sm:$0xff] }
   0x6   :  { %684 = vadd.xlane.f32.xlu0 %v683_v11  ;;  %v710_v24 = vsel %vm3816_vm0, %v660_v20, 0.0  ;;  %v658_v26 = vmul.f32 %v2058_v22, %v2058_v22  ;;  %v654_v27 = vmul.f32 %v2063_v23, %v2063_v23  ;;  %v663_v32 = vmul.f32 %v65_v28, %v65_v28  ;;  %v2101_v41 = vld [vmem:[%s3810_s2 + $0x70] sm:$0xff]  ;;  %v68_v46 = vld [vmem:[%s3810_s2 + $0x78] sm:$0xff]  ;;  %v2113_v47 = vld [vmem:[%s3810_s2 + $0x88] sm:$0xff] }
   0x7   :  { %v707_v25 = vsel %vm3816_vm0, %v659_v21, 0.0  ;;  %v661_v33 = vmul.f32 %v2077_v29, %v2077_v29  ;;  %v662_v38 = vmul.f32 %v64_v34, %v64_v34  ;;  %v664_v39 = vmul.f32 %v2089_v35, %v2089_v35  ;;  %v73_v52 = vld [vmem:[%s3810_s2 + $0xa0] sm:$0xff]  ;;  %v2125_v53 = vld [vmem:[%s3810_s2 + $0x90] sm:$0xff]  ;;  %v2134_v58 = vld [vmem:[%s3810_s2 + $0xa8] sm:$0xff] }
   0x8   :  { %v704_v30 = vsel %vm3816_vm0, %v658_v26, 0.0  ;;  %v692_v31 = vsel %vm3816_vm0, %v654_v27, 0.0  ;;  %v719_v36 = vsel %vm3816_vm0, %v663_v32, 0.0  ;;  %v667_v44 = vmul.f32 %v69_v40, %v69_v40  ;;  %v21_v59 = vld [vmem:[%s3811_s1] sm:$0xff]  ;;  %v22_v3 = vld [vmem:[%s3811_s1 + $0x8] sm:$0xff]  ;;  %v75_v20 = vld [vmem:[%s3810_s2 + $0xb0] sm:$0xff] }
   0x9   :  { %699 = vadd.xlane.f32.xlu1 %v698_v12  ;;  %v713_v37 = vsel %vm3816_vm0, %v661_v33, 0.0  ;;  %v716_v42 = vsel %vm3816_vm0, %v662_v38, 0.0  ;;  %v722_v43 = vsel %vm3816_vm0, %v664_v39, 0.0  ;;  %v665_v45 = vmul.f32 %v2101_v41, %v2101_v41  ;;  %v25_v4 = vld [vmem:[%s3811_s1 + $0x20] sm:$0xff]  ;;  %v26_v12 = vld [vmem:[%s3811_s1 + $0x28] sm:$0xff] }
   0xa   :  { %687 = vadd.xlane.f32.xlu0 %v686_v13  ;;  %v731_v48 = vsel %vm3816_vm0, %v667_v44, 0.0  ;;  %v666_v50 = vmul.f32 %v68_v46, %v68_v46  ;;  %v668_v51 = vmul.f32 %v2113_v47, %v2113_v47  ;;  %v671_v56 = vmul.f32 %v73_v52, %v73_v52  ;;  %v72_v13 = vld [vmem:[%s3810_s2 + $0x98] sm:$0xff]  ;;  %v77_v21 = vld [vmem:[%s3810_s2 + $0xc0] sm:$0xff]  ;;  %v78_v28 = vld [vmem:[%s3810_s2 + $0xc8] sm:$0xff] }
   0xb   :  { %v725_v49 = vsel %vm3816_vm0, %v665_v45, 0.0  ;;  %v669_v57 = vmul.f32 %v2125_v53, %v2125_v53  ;;  %v672_v62 = vmul.f32 %v2134_v58, %v2134_v58  ;;  %v85_v63 = vmul.f32 %v21_v59, %v21_v59  ;;  %v76_v44 = vld [vmem:[%s3810_s2 + $0xb8] sm:$0xff] }
   0xc   :  { %v728_v54 = vsel %vm3816_vm0, %v666_v50, 0.0  ;;  %v734_v55 = vsel %vm3816_vm0, %v668_v51, 0.0  ;;  %v743_v60 = vsel %vm3816_vm0, %v671_v56, 0.0  ;;  %v86_v10 = vmul.f32 %v22_v3, %v22_v3  ;;  %v79_v50 = vld [vmem:[%s3810_s2 + $0xd0] sm:$0xff]  ;;  %v81_v51 = vld [vmem:[%s3810_s2 + $0xe0] sm:$0xff]  ;;  %v24_v59 = vld [vmem:[%s3811_s1 + $0x18] sm:$0xff] }
   0xd   :  { %702 = vadd.xlane.f32.xlu1 %v701_v18  ;;  %v737_v61 = vsel %vm3816_vm0, %v669_v57, 0.0  ;;  %v746_v5 = vsel %vm3816_vm0, %v672_v62, 0.0  ;;  %v118_v7 = vsel %vm3816_vm0, %v85_v63, 0.0  ;;  %v89_v11 = vmul.f32 %v25_v4, %v25_v4  ;;  %v82_v57 = vld [vmem:[%s3810_s2 + $0xe8] sm:$0xff]  ;;  %v28_v3 = vld [vmem:[%s3811_s1 + $0x38] sm:$0xff]  ;;  %v31_v4 = vld [vmem:[%s3811_s1 + $0x50] sm:$0xff] }
   0xe   :  { %690 = vadd.xlane.f32.xlu0 %v689_v19  ;;  %v121_v14 = vsel %vm3816_vm0, %v86_v10, 0.0  ;;  %v90_v18 = vmul.f32 %v26_v12, %v26_v12  ;;  %v670_v19 = vmul.f32 %v72_v13, %v72_v13  ;;  %v673_v26 = vmul.f32 %v75_v20, %v75_v20  ;;  %v33_v12 = vld [vmem:[%s3811_s1 + $0x60] sm:$0xff]  ;;  %v34_v13 = vld [vmem:[%s3811_s1 + $0x68] sm:$0xff]  ;;  %v80_v20 = vld [vmem:[%s3810_s2 + $0xd8] sm:$0xff] }
   0xf   :  { %v130_v15 = vsel %vm3816_vm0, %v89_v11, 0.0  ;;  %v675_v27 = vmul.f32 %v77_v21, %v77_v21  ;;  %v676_v33 = vmul.f32 %v78_v28, %v78_v28  ;;  %v679_v56 = vmul.f32 %v81_v51, %v81_v51  ;;  %v83_v21 = vld [vmem:[%s3810_s2 + $0xf0] sm:$0xff]  ;;  %v32_v28 = vld [vmem:[%s3811_s1 + $0x58] sm:$0xff]  ;;  %v41_v51 = vld [vmem:[%s3811_s1 + $0xa0] sm:$0xff] }
  0x10   :  { %v680_v62 = vmul.f32 %v82_v57, %v82_v57  ;;  %v88_v63 = vmul.f32 %v24_v59, %v24_v59  ;;  %v92_v10 = vmul.f32 %v28_v3, %v28_v3  ;;  %v95_v11 = vmul.f32 %v31_v4, %v31_v4  ;;  %v42_v57 = vld [vmem:[%s3811_s1 + $0xa8] sm:$0xff]  ;;  %v40_v59 = vld [vmem:[%s3811_s1 + $0x98] sm:$0xff]  ;;  %v43_v3 = vld [vmem:[%s3811_s1 + $0xb0] sm:$0xff] }
  0x11   :  { %711 = vadd.xlane.f32.xlu1 %v710_v24  ;;  %v133_v24 = vsel %vm3816_vm0, %v90_v18, 0.0  ;;  %v755_v32 = vsel %vm3816_vm0, %v675_v27, 0.0  ;;  %v758_v38 = vsel %vm3816_vm0, %v676_v33, 0.0  ;;  %v97_v18 = vmul.f32 %v33_v12, %v33_v12  ;;  %v45_v4 = vld [vmem:[%s3811_s1 + $0xc0] sm:$0xff]  ;;  %v46_v12 = vld [vmem:[%s3811_s1 + $0xc8] sm:$0xff] }
  0x12   :  { %708 = vadd.xlane.f32.xlu0 %v707_v25  ;;  %v740_v25 = vsel %vm3816_vm0, %v670_v19, 0.0  ;;  %v98_v19 = vmul.f32 %v34_v13, %v34_v13  ;;  %v681_v27 = vmul.f32 %v83_v21, %v83_v21  ;;  %v96_v33 = vmul.f32 %v32_v28, %v32_v28  ;;  %v44_v13 = vld [vmem:[%s3811_s1 + $0xb8] sm:$0xff]  ;;  %v49_v21 = vld [vmem:[%s3811_s1 + $0xe0] sm:$0xff]  ;;  %v50_v28 = vld [vmem:[%s3811_s1 + $0xe8] sm:$0xff] }
  0x15   :  { %705 = vadd.xlane.f32.xlu1 %v704_v30  ;;  %v23_v30 = vld [vmem:[%s3811_s1 + $0x10] sm:$0xff] }
  0x16   :  { %693 = vadd.xlane.f32.xlu0 %v692_v31  ;;  %v749_v31 = vsel %vm3816_vm0, %v673_v26, 0.0  ;;  %v87_v34 = vmul.f32 %v23_v30, %v23_v30  ;;  %v678_v26 = vmul.f32 %v80_v20, %v80_v20  ;;  %v35_v30 = vld [vmem:[%s3811_s1 + $0x70] sm:$0xff] }
  0x17   :  { %v47_v20 = vld [vmem:[%s3811_s1 + $0xd0] sm:$0xff] }
  0x18   :  { %v124_v39 = vsel %vm3816_vm0, %v87_v34, 0.0  ;;  %v99_v34 = vmul.f32 %v35_v30, %v35_v30  ;;  %v48_v30 = vld [vmem:[%s3811_s1 + $0xd8] sm:$0xff] }
  0x19   :  { %720 = vadd.xlane.f32.xlu1 %v719_v36  ;;  %v27_v36 = vld [vmem:[%s3811_s1 + $0x30] sm:$0xff] }
  0x1a   :  { %714 = vadd.xlane.f32.xlu0 %v713_v37  ;;  %v29_v37 = vld [vmem:[%s3811_s1 + $0x40] sm:$0xff]  ;;  %v91_v40 = vmul.f32 %v27_v36, %v27_v36 }
  0x1b   :  { %v37_v36 = vld [vmem:[%s3811_s1 + $0x80] sm:$0xff] }
  0x1c   :  { %v136_v45 = vsel %vm3816_vm0, %v91_v40, 0.0  ;;  %v101_v40 = vmul.f32 %v37_v36, %v37_v36  ;;  %v51_v36 = vld [vmem:[%s3811_s1 + $0xf0] sm:$0xff] }
  0x1d   :  { %717 = vadd.xlane.f32.xlu1 %v716_v42  ;;  %v93_v42 = vmul.f32 %v29_v37, %v29_v37  ;;  %v38_v37 = vld [vmem:[%s3811_s1 + $0x88] sm:$0xff] }
  0x1e   :  { %723 = vadd.xlane.f32.xlu0 %v722_v43  ;;  %v30_v43 = vld [vmem:[%s3811_s1 + $0x48] sm:$0xff] }
  0x1f   :  { %v142_v46 = vsel %vm3816_vm0, %v93_v42, 0.0  ;;  %v102_v42 = vmul.f32 %v38_v37, %v38_v37  ;;  %v52_v37 = vld [vmem:[%s3811_s1 + $0xf8] sm:$0xff] }
  0x21   :  { %732 = vadd.xlane.f32.xlu1 %v731_v48  ;;  %v94_v48 = vmul.f32 %v30_v43, %v30_v43  ;;  %v84_v43 = vld [vmem:[%s3810_s2 + $0xf8] sm:$0xff] }
  0x22   :  { %726 = vadd.xlane.f32.xlu0 %v725_v49  ;;  %v674_v49 = vmul.f32 %v76_v44, %v76_v44  ;;  %v36_v44 = vld [vmem:[%s3811_s1 + $0x78] sm:$0xff] }
  0x23   :  { %v145_v52 = vsel %vm3816_vm0, %v94_v48, 0.0  ;;  %v682_v48 = vmul.f32 %v84_v43, %v84_v43 }
  0x25   :  { %729 = vadd.xlane.f32.xlu1 %v728_v54  ;;  %v752_v54 = vsel %vm3816_vm0, %v674_v49, 0.0  ;;  %v100_v49 = vmul.f32 %v36_v44, %v36_v44 }
  0x26   :  { %735 = vadd.xlane.f32.xlu0 %v734_v55  ;;  %v677_v55 = vmul.f32 %v79_v50, %v79_v50  ;;  %v39_v50 = vld [vmem:[%s3811_s1 + $0x90] sm:$0xff] }
  0x29   :  { %744 = vadd.xlane.f32.xlu1 %v743_v60  ;;  %v761_v60 = vsel %vm3816_vm0, %v677_v55, 0.0  ;;  %v103_v55 = vmul.f32 %v39_v50, %v39_v50  ;;  %v1205_v50 = vsel %vm3816_vm0, %v2029_v9, 0.0  ;;  %v1208_v9 = vsel %vm3816_vm0, %v2063_v23, 0.0 }
  0x2a   :  { %738 = vadd.xlane.f32.xlu0 %v737_v61  ;;  %v767_v61 = vsel %vm3816_vm0, %v679_v56, 0.0  ;;  %v105_v56 = vmul.f32 %v41_v51, %v41_v51  ;;  %v1217_v51 = vsel %vm3816_vm0, %v2024_v8, 0.0  ;;  %v470_v23 = vlaneseq }
  0x2d   :  { %119 = vadd.xlane.f32.xlu1 %v118_v7  ;;  %v127_v7 = vsel %vm3816_vm0, %v88_v63, 0.0  ;;  %v104_v63 = vmul.f32 %v40_v59, %v40_v59  ;;  %v1241_v59 = vsel %vm3816_vm0, %v2101_v41, 0.0 }
  0x2e   :  { %747 = vadd.xlane.f32.xlu0 %v746_v5  ;;  %v770_v5 = vsel %vm3816_vm0, %v680_v62, 0.0  ;;  %v106_v62 = vmul.f32 %v42_v57, %v42_v57 }
  0x31   :  { %131 = vadd.xlane.f32.xlu1 %v130_v15  ;;  %v148_v15 = vsel %vm3816_vm0, %v95_v11, 0.0  ;;  %v109_v11 = vmul.f32 %v45_v4, %v45_v4 }
  0x32   :  { %122 = vadd.xlane.f32.xlu0 %v121_v14  ;;  %v139_v14 = vsel %vm3816_vm0, %v92_v10, 0.0  ;;  %v107_v10 = vmul.f32 %v43_v3, %v43_v3 }
  0x35   :  { %741 = vadd.xlane.f32.xlu1 %v740_v25  ;;  %v157_v25 = vsel %vm3816_vm0, %v98_v19, 0.0  ;;  %v108_v19 = vmul.f32 %v44_v13, %v44_v13 }
  0x36   :  { %134 = vadd.xlane.f32.xlu0 %v133_v24  ;;  %v154_v24 = vsel %vm3816_vm0, %v97_v18, 0.0  ;;  %v110_v18 = vmul.f32 %v46_v12, %v46_v12 }
  0x39   :  { %756 = vadd.xlane.f32.xlu1 %v755_v32  ;;  %v773_v32 = vsel %vm3816_vm0, %v681_v27, 0.0  ;;  %v113_v27 = vmul.f32 %v49_v21, %v49_v21 }
  0x3a   :  { %750 = vadd.xlane.f32.xlu0 %v749_v31  ;;  %v764_v31 = vsel %vm3816_vm0, %v678_v26, 0.0  ;;  %v111_v26 = vmul.f32 %v47_v20, %v47_v20 }
  0x3d   :  { %125 = vadd.xlane.f32.xlu1 %v124_v39  ;;  %v160_v39 = vsel %vm3816_vm0, %v99_v34, 0.0  ;;  %v112_v34 = vmul.f32 %v48_v30, %v48_v30 }
  0x3e   :  { %759 = vadd.xlane.f32.xlu0 %v758_v38  ;;  %v151_v38 = vsel %vm3816_vm0, %v96_v33, 0.0  ;;  %v114_v33 = vmul.f32 %v50_v28, %v50_v28 }
  0x41   :  { %143 = vadd.xlane.f32.xlu1 %v142_v46  ;;  %v169_v46 = vsel %vm3816_vm0, %v102_v42, 0.0  ;;  %v116_v42 = vmul.f32 %v52_v37, %v52_v37 }
  0x42   :  { %137 = vadd.xlane.f32.xlu0 %v136_v45  ;;  %v166_v45 = vsel %vm3816_vm0, %v101_v40, 0.0  ;;  %v115_v40 = vmul.f32 %v51_v36, %v51_v36 }
  0x43   :  { %v211_v44 = vsel %vm3816_vm0, %v116_v42, 0.0 }
  0x44   :  { %v208_v43 = vsel %vm3816_vm0, %v115_v40, 0.0 }
  0x45   :  { %753 = vadd.xlane.f32.xlu1 %v752_v54  ;;  %v163_v54 = vsel %vm3816_vm0, %v100_v49, 0.0  ;;  %v1214_v49 = vsel %vm3816_vm0, %v2006_v2, 0.0 }
  0x46   :  { %146 = vadd.xlane.f32.xlu0 %v145_v52  ;;  %v776_v52 = vsel %vm3816_vm0, %v682_v48, 0.0  ;;  %v1211_v48 = vsel %vm3816_vm0, %v1996_v0, 0.0 }
  0x49   :  { %768 = vadd.xlane.f32.xlu1 %v767_v61  ;;  %v178_v61 = vsel %vm3816_vm0, %v105_v56, 0.0  ;;  %v1220_v56 = vsel %vm3816_vm0, %v2058_v22, 0.0 }
  0x4a   :  { %762 = vadd.xlane.f32.xlu0 %v761_v60  ;;  %v172_v60 = vsel %vm3816_vm0, %v103_v55, 0.0  ;;  %v1238_v55 = vsel %vm3816_vm0, %v2089_v35, 0.0  ;;  %v471_v35 = vand.u32 127, %v470_v23 }
  0x4c   :  { %v483_v41 = vadd.s32 4294967280, %v471_v35  ;;  %v490_v3 = vadd.s32 4294967272, %v471_v35 }
  0x4d   :  { %128 = vadd.xlane.f32.xlu1 %v127_v7  ;;  %v175_v7 = vsel %vm3816_vm0, %v104_v63, 0.0  ;;  %v1250_v63 = vsel %vm3816_vm0, %v2113_v47, 0.0  ;;  %v1253_v47 = vsel %vm3816_vm0, %v2125_v53, 0.0 }
  0x4e   :  { %771 = vadd.xlane.f32.xlu0 %v770_v5  ;;  %v181_v5 = vsel %vm3816_vm0, %v106_v62, 0.0 }
  0x51   :  { %149 = vadd.xlane.f32.xlu1 %v148_v15  ;;  %v190_v15 = vsel %vm3816_vm0, %v109_v11, 0.0 }
  0x52   :  { %140 = vadd.xlane.f32.xlu0 %v139_v14  ;;  %v184_v14 = vsel %vm3816_vm0, %v107_v10, 0.0 }
  0x55   :  { %158 = vadd.xlane.f32.xlu1 %v157_v25  ;;  %v187_v25 = vsel %vm3816_vm0, %v108_v19, 0.0 }
  0x56   :  { %155 = vadd.xlane.f32.xlu0 %v154_v24  ;;  %v193_v24 = vsel %vm3816_vm0, %v110_v18, 0.0 }
  0x59   :  { %774 = vadd.xlane.f32.xlu1 %v773_v32  ;;  %v202_v32 = vsel %vm3816_vm0, %v113_v27, 0.0 }
  0x5a   :  { %765 = vadd.xlane.f32.xlu0 %v764_v31  ;;  %v196_v31 = vsel %vm3816_vm0, %v111_v26, 0.0 }
  0x5d   :  { %161 = vadd.xlane.f32.xlu1 %v160_v39  ;;  %v199_v39 = vsel %vm3816_vm0, %v112_v34, 0.0 }
  0x5e   :  { %152 = vadd.xlane.f32.xlu0 %v151_v38  ;;  %v205_v38 = vsel %vm3816_vm0, %v114_v33, 0.0 }
  0x61   :  { %170 = vadd.xlane.f32.xlu1 %v169_v46  ;;  %v1202_v46 = vsel %vm3816_vm0, %v2017_v6, 0.0  ;;  %v1226_v6 = vsel %vm3816_vm0, %v2042_v16, 0.0 }
  0x62   :  { %167 = vadd.xlane.f32.xlu0 %v166_v45  ;;  %v1199_v45 = vsel %vm3816_vm0, %v2001_v1, 0.0  ;;  %v1223_v1 = vsel %vm3816_vm0, %v2047_v17, 0.0  ;;  %v1229_v17 = vsel %vm3816_vm0, %v2077_v29, 0.0 }
  0x65   :  { %164 = vadd.xlane.f32.xlu1 %v163_v54 }
  0x66   :  { %777 = vadd.xlane.f32.xlu0 %v776_v52 }
  0x69   :  { %179 = vadd.xlane.f32.xlu1 %v178_v61  ;;  %v476_v61 = vadd.s32 4294967288, %v471_v35 }
  0x6a   :  { %173 = vadd.xlane.f32.xlu0 %v172_v60  ;;  %v2360_v60 = vshrl.u32 %v470_v23, 7 }
  0x6c   :  { %3826 = vst [vmem:[#allocation3_spill] sm:$0xff] %v2360_v60  ;;  %v2375_v10 = vsub.s32 %v476_v61, %v2360_v60  ;;  %v2385_v13 = vsub.s32 %v483_v41, %v2360_v60 }
  0x6d   :  { %176 = vadd.xlane.f32.xlu1 %v175_v7  ;;  %v2372_v7 = vsub.s32 %v471_v35, %v2360_v60 }
  0x6e   :  { %182 = vadd.xlane.f32.xlu0 %v181_v5 }
  0x71   :  { %191 = vadd.xlane.f32.xlu1 %v190_v15  ;;  %v1262_v15 = vsel %vm3816_vm0, %v2134_v58, 0.0 }
  0x72   :  { %185 = vadd.xlane.f32.xlu0 %v184_v14  ;;  %v2388_v14 = vsub.s32 %v490_v3, %v2360_v60 }
  0x75   :  { %188 = vadd.xlane.f32.xlu1 %v187_v25 }
  0x76   :  { %194 = vadd.xlane.f32.xlu0 %v193_v24 }
  0x79   :  { %203 = vadd.xlane.f32.xlu1 %v202_v32 }
  0x7a   :  { %197 = vadd.xlane.f32.xlu0 %v196_v31 }
  0x7d   :  { %200 = vadd.xlane.f32.xlu1 %v199_v39 }
  0x7e   :  { %206 = vadd.xlane.f32.xlu0 %v205_v38 }
  0x81   :  { %212 = vadd.xlane.f32.xlu1 %v211_v44 }
  0x82   :  { %209 = vadd.xlane.f32.xlu0 %v208_v43 }
  0x85   :  { %1203 = vadd.xlane.f32.xlu1 %v1202_v46 }
  0x86   :  { %1200 = vadd.xlane.f32.xlu0 %v1199_v45 }
  0x89   :  { %1215 = vadd.xlane.f32.xlu1 %v1214_v49 }
  0x8a   :  { %1212 = vadd.xlane.f32.xlu0 %v1211_v48 }
  0x8d   :  { %1218 = vadd.xlane.f32.xlu1 %v1217_v51 }
  0x8e   :  { %1206 = vadd.xlane.f32.xlu0 %v1205_v50 }
  0x91   :  { %1227 = vadd.xlane.f32.xlu1 %v1226_v6 }
  0x92   :  { %1224 = vadd.xlane.f32.xlu0 %v1223_v1  ;;  %v2329_v0 = vpop.xlane.xlu1 %696 }
  0x93   :  { %v2331_v2 = vpop.xlane.xlu0 %684  ;;  %1813 = vrsqrt.f32 %v2329_v0  ;;  %vm809_vm1 = vcmp.eq.f32.partialorder %v2329_v0, inf  ;;  %vm811_vm2 = vcmp.eq.f32.partialorder %v2329_v0, 0.0  ;;  %v812_v21 = vand.u32 2147483648, %v2329_v0 }
  0x94   :  { %1815 = vrsqrt.f32 %v2331_v2  ;;  %vm781_vm3 = vcmp.eq.f32.partialorder %v2331_v2, inf  ;;  %vm783_vm4 = vcmp.eq.f32.partialorder %v2331_v2, 0.0  ;;  %v784_v24 = vand.u32 2147483648, %v2331_v2 }
  0x95   :  { %1221 = vadd.xlane.f32.xlu1 %v1220_v56 }
  0x96   :  { %1209 = vadd.xlane.f32.xlu0 %v1208_v9  ;;  %v2335_v52 = vpop.xlane.xlu1 %699 }
  0x97   :  { %v2337_v8 = vpop.xlane.xlu0 %687  ;;  %1817 = vrsqrt.f32 %v2335_v52  ;;  %vm816_vm5 = vcmp.eq.f32.partialorder %v2335_v52, inf  ;;  %vm818_vm6 = vcmp.eq.f32.partialorder %v2335_v52, 0.0  ;;  %v819_v58 = vand.u32 2147483648, %v2335_v52 }
  0x98   :  { %1819 = vrsqrt.f32 %v2337_v8  ;;  %vm788_vm7 = vcmp.eq.f32.partialorder %v2337_v8, inf  ;;  %vm790_vm8 = vcmp.eq.f32.partialorder %v2337_v8, 0.0  ;;  %v791_v28 = vand.u32 2147483648, %v2337_v8 }
  0x9a   :  { %1230 = vadd.xlane.f32.xlu0 %v1229_v17  ;;  %v2342_v16 = vpop.xlane.xlu1 %702 }
  0x9b   :  { %v2344_v54 = vpop.xlane.xlu0 %690  ;;  %1821 = vrsqrt.f32 %v2342_v16  ;;  %vm823_vm9 = vcmp.eq.f32.partialorder %v2342_v16, inf  ;;  %vm825_vm10 = vcmp.eq.f32.partialorder %v2342_v16, 0.0  ;;  %v826_v37 = vand.u32 2147483648, %v2342_v16 }
  0x9c   :  { %1823 = vrsqrt.f32 %v2344_v54  ;;  %vm795_vm11 = vcmp.eq.f32.partialorder %v2344_v54, inf  ;;  %vm797_vm12 = vcmp.eq.f32.partialorder %v2344_v54, 0.0  ;;  %v798_v39 = vand.u32 2147483648, %v2344_v54 }
  0x9d   :  { %v1814_v4 = vpop.eup %1813 }
  0x9e   :  { %1239 = vadd.xlane.f32.xlu0 %v1238_v55  ;;  %v2352_v29 = vpop.xlane.xlu1 %711  ;;  %v1816_v5 = vpop.eup %1815  ;;  %v808_v19 = vmul.f32 %v1814_v4, %v2329_v0 }
  0x9f   :  { %v2354_v57 = vpop.xlane.xlu0 %708  ;;  %1825 = vrsqrt.f32 %v2352_v29  ;;  %v780_v20 = vmul.f32 %v1816_v5, %v2331_v2  ;;  %vm844_vm13 = vcmp.eq.f32.partialorder %v2352_v29, inf  ;;  %v847_v40 = vand.u32 2147483648, %v2352_v29 }
  0xa0   :  { %1827 = vrsqrt.f32 %v2354_v57  ;;  %v810_v31 = vsel %vm809_vm1, %v2329_v0, %v808_v19  ;;  %vm846_vm14 = vcmp.eq.f32.partialorder %v2352_v29, 0.0  ;;  %vm837_vm15 = vcmp.eq.f32.partialorder %v2354_v57, inf }
  0xa1   :  { %v1818_v18 = vpop.eup %1817  ;;  %v782_v32 = vsel %vm781_vm3, %v2331_v2, %v780_v20  ;;  %v2435_v44 = vsel %vm811_vm2, %v812_v21, %v810_v31  ;;  %vm839_vm1 = vcmp.eq.f32.partialorder %v2354_v57, 0.0  ;;  %v840_v9 = vand.u32 2147483648, %v2354_v57 }
  0xa2   :  { %1242 = vadd.xlane.f32.xlu0 %v1241_v59  ;;  %v2363_v22 = vpop.xlane.xlu1 %705  ;;  %v1820_v53 = vpop.eup %1819  ;;  %v815_v33 = vmul.f32 %v1818_v18, %v2335_v52  ;;  %v2439_v45 = vsel %vm783_vm4, %v784_v24, %v782_v32  ;;  %v1057_v0 = vrot.slane %v2435_v44, %v2372_v7 }
  0xa3   :  { %v2365_v62 = vpop.xlane.xlu0 %693  ;;  %1829 = vrsqrt.f32 %v2363_v22  ;;  %v787_v34 = vmul.f32 %v1820_v53, %v2337_v8  ;;  %v1038_v2 = vrot.slane %v2439_v45, %v2372_v7  ;;  %vm830_vm2 = vcmp.eq.f32.partialorder %v2363_v22, inf }
  0xa4   :  { %1831 = vrsqrt.f32 %v2365_v62  ;;  %v817_v48 = vsel %vm816_vm5, %v2335_v52, %v815_v33  ;;  %vm832_vm3 = vcmp.eq.f32.partialorder %v2363_v22, 0.0  ;;  %v833_v52 = vand.u32 2147483648, %v2363_v22 }
  0xa5   :  { %v1822_v27 = vpop.eup %1821  ;;  %v789_v49 = vsel %vm788_vm7, %v2337_v8, %v787_v34  ;;  %v2468_v23 = vsel %vm818_vm6, %v819_v58, %v817_v48  ;;  %vm802_vm4 = vcmp.eq.f32.partialorder %v2365_v62, inf  ;;  %vm804_vm5 = vcmp.eq.f32.partialorder %v2365_v62, 0.0 }
  0xa6   :  { %1251 = vadd.xlane.f32.xlu0 %v1250_v63  ;;  %v2377_v11 = vpop.xlane.xlu1 %720  ;;  %v1824_v30 = vpop.eup %1823  ;;  %v822_v46 = vmul.f32 %v1822_v27, %v2342_v16  ;;  %v2472_v56 = vsel %vm790_vm8, %v791_v28, %v789_v49  ;;  %v1061_v3 = vrot.slane %v2468_v23, %v2375_v10 }
  0xa7   :  { %v2379_v12 = vpop.xlane.xlu0 %714  ;;  %1833 = vrsqrt.f32 %v2377_v11  ;;  %v794_v50 = vmul.f32 %v1824_v30, %v2344_v54  ;;  %v1042_v4 = vrot.slane %v2472_v56, %v2375_v10  ;;  %vm865_vm6 = vcmp.eq.f32.partialorder %v2377_v11, inf }
  0xa8   :  { %1835 = vrsqrt.f32 %v2379_v12  ;;  %v824_v59 = vsel %vm823_vm9, %v2342_v16, %v822_v46  ;;  %v868_v53 = vand.u32 2147483648, %v2377_v11  ;;  %vm851_vm7 = vcmp.eq.f32.partialorder %v2379_v12, inf }
  0xa9   :  { %v1826_v36 = vpop.eup %1825  ;;  %v796_v35 = vsel %vm795_vm11, %v2344_v54, %v794_v50  ;;  %v2498_v5 = vsel %vm825_vm10, %v826_v37, %v824_v59  ;;  %vm867_vm8 = vcmp.eq.f32.partialorder %v2377_v11, 0.0  ;;  %vm853_vm9 = vcmp.eq.f32.partialorder %v2379_v12, 0.0 }
  0xaa   :  { %1254 = vadd.xlane.f32.xlu0 %v1253_v47  ;;  %v2404_v25 = vpop.xlane.xlu1 %717  ;;  %v1828_v38 = vpop.eup %1827  ;;  %v843_v51 = vmul.f32 %v1826_v36, %v2352_v29  ;;  %v805_v47 = vand.u32 2147483648, %v2365_v62  ;;  %v2508_v20 = vsel %vm797_vm12, %v798_v39, %v796_v35  ;;  %v1066_v27 = vrot.slane %v2498_v5, %v2385_v13 }
  0xab   :  { %v2406_v26 = vpop.xlane.xlu0 %723  ;;  %1837 = vrsqrt.f32 %v2404_v25  ;;  %v836_v1 = vmul.f32 %v1828_v38, %v2354_v57  ;;  %vm858_vm10 = vcmp.eq.f32.partialorder %v2404_v25, inf  ;;  %v861_v31 = vand.u32 2147483648, %v2404_v25 }
  0xac   :  { %1839 = vrsqrt.f32 %v2406_v26  ;;  %v845_v8 = vsel %vm844_vm13, %v2352_v29, %v843_v51  ;;  %v854_v29 = vand.u32 2147483648, %v2379_v12  ;;  %vm872_vm11 = vcmp.eq.f32.partialorder %v2406_v26, inf }
  0xad   :  { %v1830_v6 = vpop.eup %1829  ;;  %v838_v63 = vsel %vm837_vm15, %v2354_v57, %v836_v1  ;;  %v2515_v21 = vsel %vm846_vm14, %v847_v40, %v845_v8  ;;  %v1047_v57 = vrot.slane %v2508_v20, %v2385_v13  ;;  %vm860_vm12 = vcmp.eq.f32.partialorder %v2404_v25, 0.0 }
  0xae   :  { %1263 = vadd.xlane.f32.xlu0 %v1262_v15  ;;  %v2429_v42 = vpop.xlane.xlu1 %732  ;;  %v1832_v61 = vpop.eup %1831  ;;  %v829_v41 = vmul.f32 %v1830_v6, %v2363_v22  ;;  %v2519_v24 = vsel %vm839_vm1, %v840_v9, %v838_v63  ;;  %v1080_v34 = vrot.slane %v2515_v21, %v2375_v10  ;;  %vm874_vm13 = vcmp.eq.f32.partialorder %v2406_v26, 0.0 }
  0xaf   :  { %v2431_v43 = vpop.xlane.xlu0 %726  ;;  %1841 = vrsqrt.f32 %v2429_v42  ;;  %v801_v58 = vmul.f32 %v1832_v61, %v2365_v62  ;;  %v1076_v36 = vrot.slane %v2519_v24, %v2372_v7  ;;  %v875_v37 = vand.u32 2147483648, %v2406_v26 }
  0xb0   :  { %1843 = vrsqrt.f32 %v2431_v43  ;;  %v831_v28 = vsel %vm830_vm2, %v2363_v22, %v829_v41  ;;  %vm893_vm14 = vcmp.eq.f32.partialorder %v2429_v42, inf  ;;  %vm895_vm15 = vcmp.eq.f32.partialorder %v2429_v42, 0.0 }
  0xb1   :  { %v1834_v19 = vpop.eup %1833  ;;  %v2550_v38 = vsel %vm832_vm3, %v833_v52, %v831_v28  ;;  %v803_v39 = vsel %vm802_vm4, %v2365_v62, %v801_v58  ;;  %v896_v51 = vand.u32 2147483648, %v2429_v42  ;;  %vm879_vm1 = vcmp.eq.f32.partialorder %v2431_v43, inf }
  0xb2   :  { %v2462_v17 = vpop.xlane.xlu1 %729  ;;  %v1836_v16 = vpop.eup %1835  ;;  %v864_v40 = vmul.f32 %v1834_v19, %v2377_v11  ;;  %v2573_v59 = vsel %vm804_vm5, %v805_v47, %v803_v39  ;;  %vm881_vm2 = vcmp.eq.f32.partialorder %v2431_v43, 0.0 }
  0xb3   :  { %v2464_v55 = vpop.xlane.xlu0 %735  ;;  %1845 = vrsqrt.f32 %v2462_v17  ;;  %v850_v46 = vmul.f32 %v1836_v16, %v2379_v12  ;;  %v1052_v19 = vrot.slane %v2573_v59, %v2388_v14  ;;  %v882_v16 = vand.u32 2147483648, %v2431_v43 }
  0xb4   :  { %1847 = vrsqrt.f32 %v2464_v55  ;;  %v866_v35 = vsel %vm865_vm6, %v2377_v11, %v864_v40  ;;  %vm886_vm3 = vcmp.eq.f32.partialorder %v2462_v17, inf  ;;  %vm888_vm4 = vcmp.eq.f32.partialorder %v2462_v17, 0.0 }
  0xb5   :  { %v1838_v54 = vpop.eup %1837  ;;  %v852_v52 = vsel %vm851_vm7, %v2379_v12, %v850_v46  ;;  %v2606_v28 = vsel %vm867_vm8, %v868_v53, %v866_v35  ;;  %v889_v39 = vand.u32 2147483648, %v2462_v17  ;;  %vm900_vm5 = vcmp.eq.f32.partialorder %v2464_v55, inf }
  0xb6   :  { %v2502_v15 = vpop.xlane.xlu1 %744  ;;  %v1840_v30 = vpop.eup %1839  ;;  %v857_v49 = vmul.f32 %v1838_v54, %v2404_v25  ;;  %vm481_vm6 = vcmask 130112   ;;  %vm902_vm7 = vcmp.eq.f32.partialorder %v2464_v55, 0.0 }
  0xb7   :  { %v2504_v18 = vpop.xlane.xlu0 %738  ;;  %v871_v50 = vmul.f32 %v1840_v30, %v2406_v26  ;;  %1849 = vrsqrt.f32 %v2502_v15  ;;  %v2610_v30 = vsel %vm853_vm9, %v854_v29, %v852_v52  ;;  %vm921_vm8 = vcmp.eq.f32.partialorder %v2502_v15, inf }
  0xb8   :  { %1851 = vrsqrt.f32 %v2504_v18  ;;  %v859_v62 = vsel %vm858_vm10, %v2404_v25, %v857_v49  ;;  %vm907_vm9 = vcmp.eq.f32.partialorder %v2504_v18, inf  ;;  %vm923_vm10 = vcmp.eq.f32.partialorder %v2502_v15, 0.0 }
  0xb9   :  { %v1842_v48 = vpop.eup %1841  ;;  %v873_v63 = vsel %vm872_vm11, %v2406_v26, %v871_v50  ;;  %v2616_v40 = vsel %vm860_vm12, %v861_v31, %v859_v62  ;;  %v903_v31 = vand.u32 2147483648, %v2464_v55  ;;  %vm488_vm12 = vcmask 195712  }
  0xba   :  { %v2539_v33 = vpop.xlane.xlu1 %119  ;;  %v1844_v22 = vpop.eup %1843  ;;  %v892_v61 = vmul.f32 %v1842_v48, %v2429_v42  ;;  %v2620_v46 = vsel %vm874_vm13, %v875_v37, %v873_v63  ;;  %vm909_vm13 = vcmp.eq.f32.partialorder %v2504_v18, 0.0 }
  0xbb   :  { %v2537_v32 = vpop.xlane.xlu0 %747  ;;  %v878_v41 = vmul.f32 %v1844_v22, %v2431_v43  ;;  %v924_v22 = vand.u32 2147483648, %v2502_v15 }
  0xbc   :  { %1853 = vrsqrt.f32 %v2537_v32  ;;  %v894_v11 = vsel %vm893_vm14, %v2429_v42, %v892_v61  ;;  %v910_v42 = vand.u32 2147483648, %v2504_v18  ;;  %vm928_vm11 = vcmp.eq.f32.partialorder %v2537_v32, inf }
  0xbd   :  { %1855 = vrsqrt.f32 %v2539_v33  ;;  %v1846_v8 = vpop.eup %1845  ;;  %v880_v12 = vsel %vm879_vm1, %v2431_v43, %v878_v41  ;;  %v2644_v50 = vsel %vm895_vm15, %v896_v51, %v894_v11  ;;  %v931_v41 = vand.u32 2147483648, %v2537_v32 }
  0xbe   :  { %v2567_v6 = vpop.xlane.xlu1 %131  ;;  %v1848_v47 = vpop.eup %1847  ;;  %v885_v53 = vmul.f32 %v1846_v8, %v2462_v17  ;;  %v2655_v8 = vsel %vm881_vm2, %v882_v16, %v880_v12  ;;  %vm216_vm14 = vcmp.eq.f32.partialorder %v2539_v33, inf  ;;  %v219_v11 = vand.u32 2147483648, %v2539_v33 }
  0xbf   :  { %v2565_v1 = vpop.xlane.xlu0 %122  ;;  %v899_v25 = vmul.f32 %v1848_v47, %v2464_v55  ;;  %vm218_vm15 = vcmp.eq.f32.partialorder %v2539_v33, 0.0  ;;  %vm244_vm0 = vcmp.eq.f32.partialorder %v2567_v6, inf  ;;  %vm246_vm2 = vcmp.eq.f32.partialorder %v2567_v6, 0.0 }
  0xc0   :  { %1857 = vrsqrt.f32 %v2565_v1  ;;  %v887_v62 = vsel %vm886_vm3, %v2462_v17, %v885_v53  ;;  %vm223_vm1 = vcmp.eq.f32.partialorder %v2565_v1, inf  ;;  %vm930_vm3 = vcmp.eq.f32.partialorder %v2537_v32, 0.0 }
  0xc1   :  { %1859 = vrsqrt.f32 %v2567_v6  ;;  %v1850_v49 = vpop.eup %1849  ;;  %v901_v63 = vsel %vm900_vm5, %v2464_v55, %v899_v25  ;;  %v2686_v26 = vsel %vm888_vm4, %v889_v39, %v887_v62  ;;  %vm225_vm5 = vcmp.eq.f32.partialorder %v2565_v1, 0.0 }
  0xc2   :  { %v2600_v54 = vpop.xlane.xlu1 %741  ;;  %v1852_v35 = vpop.eup %1851  ;;  %v920_v16 = vmul.f32 %v1850_v49, %v2502_v15  ;;  %v226_v49 = vand.u32 2147483648, %v2565_v1  ;;  %v2690_v52 = vsel %vm902_vm7, %v903_v31, %v901_v63  ;;  %v247_v17 = vand.u32 2147483648, %v2567_v6 }
  0xc3   :  { %v2598_v58 = vpop.xlane.xlu0 %134  ;;  %v906_v61 = vmul.f32 %v1852_v35, %v2504_v18 }
  0xc4   :  { %1861 = vrsqrt.f32 %v2598_v58  ;;  %v922_v55 = vsel %vm921_vm8, %v2502_v15, %v920_v16  ;;  %vm251_vm4 = vcmp.eq.f32.partialorder %v2598_v58, inf  ;;  %vm253_vm7 = vcmp.eq.f32.partialorder %v2598_v58, 0.0 }
  0xc5   :  { %1863 = vrsqrt.f32 %v2600_v54  ;;  %v908_v16 = vsel %vm907_vm9, %v2504_v18, %v906_v61  ;;  %vm914_vm8 = vcmp.eq.f32.partialorder %v2600_v54, inf  ;;  %vm916_vm9 = vcmp.eq.f32.partialorder %v2600_v54, 0.0 }
  0xc6   :  { %v2640_v48 = vpop.xlane.xlu1 %756  ;;  %v1854_v51 = vpop.eup %1853 }
  0xc7   :  { %v2638_v37 = vpop.xlane.xlu0 %750  ;;  %v1856_v43 = vpop.eup %1855  ;;  %v927_v39 = vmul.f32 %v1854_v51, %v2537_v32  ;;  %v1043_v51 = vsel %vm481_vm6, %v1042_v4, %v1038_v2  ;;  %v254_v2 = vand.u32 2147483648, %v2598_v58 }
  0xc8   :  { %1865 = vrsqrt.f32 %v2638_v37  ;;  %v215_v29 = vmul.f32 %v1856_v43, %v2539_v33  ;;  %v938_v18 = vand.u32 2147483648, %v2638_v37 }
  0xc9   :  { %1867 = vrsqrt.f32 %v2640_v48  ;;  %v929_v56 = vsel %vm928_vm11, %v2537_v32, %v927_v39  ;;  %v917_v39 = vand.u32 2147483648, %v2600_v54  ;;  %vm937_vm11 = vcmp.eq.f32.partialorder %v2638_v37, 0.0 }
  0xca   :  { %v2676_v53 = vpop.xlane.xlu1 %125  ;;  %v1858_v25 = vpop.eup %1857  ;;  %v217_v45 = vsel %vm216_vm14, %v2539_v33, %v215_v29 }
  0xcb   :  { %v2674_v12 = vpop.xlane.xlu0 %759  ;;  %v1860_v47 = vpop.eup %1859  ;;  %v222_v31 = vmul.f32 %v1858_v25, %v2565_v1  ;;  %1869 = vrsqrt.f32 %v2676_v53  ;;  %v2750_v25 = vsel %vm909_vm13, %v910_v42, %v908_v16  ;;  %v1048_v42 = vsel %vm488_vm12, %v1047_v57, %v1043_v51 }
  0xcc   :  { %v243_v9 = vmul.f32 %v1860_v47, %v2567_v6  ;;  %1871 = vrsqrt.f32 %v2674_v12  ;;  %v2729_v47 = vsel %vm923_vm10, %v924_v22, %v922_v55  ;;  %vm935_vm10 = vcmp.eq.f32.partialorder %v2638_v37, inf }
  0xcd   :  { %v224_v4 = vsel %vm223_vm1, %v2565_v1, %v222_v31  ;;  %v2759_v31 = vsel %vm218_vm15, %v219_v11, %v217_v45  ;;  %v952_v11 = vand.u32 2147483648, %v2640_v48  ;;  %vm3827_vm13 = vcmask 261312  }
  0xce   :  { %v2708_v62 = vpop.xlane.xlu1 %143  ;;  %v1862_v63 = vpop.eup %1861  ;;  %v245_v55 = vsel %vm244_vm0, %v2567_v6, %v243_v9  ;;  %v2776_v33 = vsel %vm225_vm5, %v226_v49, %v224_v4  ;;  %vm949_vm0 = vcmp.eq.f32.partialorder %v2640_v48, inf  ;;  %v2797_v49 = vsel %vm3827_vm13, %v1052_v19, %v1048_v42 }
  0xcf   :  { %v2706_v35 = vpop.xlane.xlu0 %137  ;;  %v250_v15 = vmul.f32 %v1862_v63, %v2598_v58  ;;  %v1864_v29 = vpop.eup %1863  ;;  %v2772_v63 = vsel %vm930_vm3, %v931_v41, %v929_v56  ;;  %v2782_v20 = vsel %vm246_vm2, %v247_v17, %v245_v55  ;;  %vm956_vm14 = vcmp.eq.f32.partialorder %v2674_v12, inf }
  0xd0   :  { %1873 = vrsqrt.f32 %v2706_v35  ;;  %v913_v32 = vmul.f32 %v1864_v29, %v2600_v54  ;;  %v959_v51 = vand.u32 2147483648, %v2674_v12  ;;  %v1062_v16 = vsel %vm481_vm6, %v1061_v3, %v1057_v0 }
  0xd1   :  { %1875 = vrsqrt.f32 %v2708_v62  ;;  %v252_v57 = vsel %vm251_vm4, %v2598_v58, %v250_v15  ;;  %vm951_vm15 = vcmp.eq.f32.partialorder %v2640_v48, 0.0  ;;  %vm230_vm1 = vcmp.eq.f32.partialorder %v2676_v53, inf }
  0xd2   :  { %v2746_v61 = vpop.xlane.xlu1 %753  ;;  %v1866_v9 = vpop.eup %1865  ;;  %v2820_v23 = vsel %vm253_vm7, %v254_v2, %v252_v57  ;;  %vm232_vm2 = vcmp.eq.f32.partialorder %v2676_v53, 0.0  ;;  %v233_v0 = vand.u32 2147483648, %v2676_v53  ;;  %v915_v4 = vsel %vm914_vm8, %v2600_v54, %v913_v32 }
  0xd3   :  { %v2744_v22 = vpop.xlane.xlu0 %146  ;;  %v1868_v6 = vpop.eup %1867  ;;  %v934_v45 = vmul.f32 %v1866_v9, %v2638_v37  ;;  %vm958_vm3 = vcmp.eq.f32.partialorder %v2674_v12, 0.0  ;;  %vm258_vm5 = vcmp.eq.f32.partialorder %v2706_v35, inf  ;;  %vm260_vm4 = vcmp.eq.f32.partialorder %v2706_v35, 0.0 }
  0xd4   :  { %1877 = vrsqrt.f32 %v2744_v22  ;;  %v948_v15 = vmul.f32 %v1868_v6, %v2640_v48  ;;  %v261_v42 = vand.u32 2147483648, %v2706_v35  ;;  %vm272_vm7 = vcmp.eq.f32.partialorder %v2708_v62, inf }
  0xd5   :  { %v1870_v59 = vpop.eup %1869  ;;  %1879 = vrsqrt.f32 %v2746_v61  ;;  %v936_v57 = vsel %vm935_vm10, %v2638_v37, %v934_v45  ;;  %vm274_vm8 = vcmp.eq.f32.partialorder %v2708_v62, 0.0  ;;  %v275_v44 = vand.u32 2147483648, %v2708_v62 }
  0xd6   :  { %v2791_v1 = vpop.xlane.xlu1 %768  ;;  %v1872_v56 = vpop.eup %1871  ;;  %v229_v55 = vmul.f32 %v1870_v59, %v2676_v53  ;;  %vm279_vm13 = vcmp.eq.f32.partialorder %v2744_v22, inf  ;;  %v2853_v9 = vsel %vm916_vm9, %v917_v39, %v915_v4  ;;  %v950_v45 = vsel %vm949_vm0, %v2640_v48, %v948_v15 }
  0xd7   :  { %v2789_v41 = vpop.xlane.xlu0 %762  ;;  %v955_v32 = vmul.f32 %v1872_v56, %v2674_v12  ;;  %vm281_vm10 = vcmp.eq.f32.partialorder %v2744_v22, 0.0  ;;  %v2867_v17 = vsel %vm937_vm11, %v938_v18, %v936_v57  ;;  %v282_v39 = vand.u32 2147483648, %v2744_v22 }
  0xd8   :  { %1881 = vrsqrt.f32 %v2789_v41  ;;  %v231_v54 = vsel %vm230_vm1, %v2676_v53, %v229_v55  ;;  %vm942_vm9 = vcmp.eq.f32.partialorder %v2746_v61, inf  ;;  %v945_v37 = vand.u32 2147483648, %v2746_v61 }
  0xd9   :  { %1883 = vrsqrt.f32 %v2791_v1  ;;  %v957_v4 = vsel %vm956_vm14, %v2674_v12, %v955_v32  ;;  %v1067_v55 = vsel %vm488_vm12, %v1066_v27, %v1062_v16  ;;  %v1081_v57 = vsel %vm481_vm6, %v1080_v34, %v1076_v36 }
  0xda   :  { %v1874_v3 = vpop.eup %1873  ;;  %v2834_v2 = vpop.xlane.xlu1 %128  ;;  %vm963_vm0 = vcmp.eq.f32.partialorder %v2789_v41, inf  ;;  %v966_v5 = vand.u32 2147483648, %v2789_v41  ;;  %v2918_v34 = vsel %vm958_vm3, %v959_v51, %v957_v4  ;;  %vm944_vm11 = vcmp.eq.f32.partialorder %v2746_v61, 0.0 }
  0xdb   :  { %v2832_v58 = vpop.xlane.xlu0 %771  ;;  %v1876_v29 = vpop.eup %1875  ;;  %1885 = vrsqrt.f32 %v2834_v2  ;;  %v257_v59 = vmul.f32 %v1874_v3, %v2706_v35  ;;  %vm977_vm14 = vcmp.eq.f32.partialorder %v2791_v1, inf  ;;  %v980_v36 = vand.u32 2147483648, %v2791_v1 }
  0xdc   :  { %v271_v56 = vmul.f32 %v1876_v29, %v2708_v62  ;;  %1887 = vrsqrt.f32 %v2832_v58  ;;  %v2888_v29 = vsel %vm951_vm15, %v952_v11, %v950_v45  ;;  %v3828_v12 = vrot.slane %v2550_v38, %v2388_v14 }
  0xdd   :  { %v259_v18 = vsel %vm258_vm5, %v2706_v35, %v257_v59  ;;  %vm3829_vm15 = vcmask 261312   ;;  %vm965_vm1 = vcmp.eq.f32.partialorder %v2789_v41, 0.0  ;;  %v3830_v59 = vrot.slane %v2610_v30, %v2385_v13 }
  0xde   :  { %v1878_v6 = vpop.eup %1877  ;;  %v2863_v3 = vpop.xlane.xlu1 %149  ;;  %v273_v48 = vsel %vm272_vm7, %v2708_v62, %v271_v56  ;;  %v2926_v11 = vsel %vm260_vm4, %v261_v42, %v259_v18  ;;  %v2936_v51 = vsel %vm3829_vm15, %v3828_v12, %v1067_v55  ;;  %vm984_vm3 = vcmp.eq.f32.partialorder %v2832_v58, inf }
  0xdf   :  { %v2861_v19 = vpop.xlane.xlu0 %140  ;;  %v278_v15 = vmul.f32 %v1878_v6, %v2744_v22  ;;  %v1880_v32 = vpop.eup %1879  ;;  %v2903_v6 = vsel %vm232_vm2, %v233_v0, %v231_v54  ;;  %v2942_v35 = vsel %vm274_vm8, %v275_v44, %v273_v48  ;;  %vm979_vm2 = vcmp.eq.f32.partialorder %v2791_v1, 0.0 }
  0xe0   :  { %1889 = vrsqrt.f32 %v2861_v19  ;;  %v941_v42 = vmul.f32 %v1880_v32, %v2746_v61  ;;  %v1086_v38 = vsel %vm488_vm12, %v3830_v59, %v1081_v57  ;;  %vm237_vm5 = vcmp.eq.f32.partialorder %v2834_v2, inf }
  0xe1   :  { %1891 = vrsqrt.f32 %v2863_v3  ;;  %v280_v16 = vsel %vm279_vm13, %v2744_v22, %v278_v15  ;;  %vm239_vm4 = vcmp.eq.f32.partialorder %v2834_v2, 0.0  ;;  %v240_v57 = vand.u32 2147483648, %v2834_v2 }
  0xe2   :  { %v2912_v24 = vpop.xlane.xlu1 %158  ;;  %v1882_v21 = vpop.eup %1881  ;;  %v2963_v30 = vsel %vm281_vm10, %v282_v39, %v280_v16  ;;  %vm265_vm7 = vcmp.eq.f32.partialorder %v2861_v19, inf  ;;  %v943_v22 = vsel %vm942_vm9, %v2746_v61, %v941_v42  ;;  %vm986_vm8 = vcmp.eq.f32.partialorder %v2832_v58, 0.0 }
  0xe3   :  { %v2910_v27 = vpop.xlane.xlu0 %155  ;;  %v1884_v53 = vpop.eup %1883  ;;  %v962_v56 = vmul.f32 %v1882_v21, %v2789_v41  ;;  %vm267_vm13 = vcmp.eq.f32.partialorder %v2861_v19, 0.0  ;;  %v268_v16 = vand.u32 2147483648, %v2861_v19  ;;  %vm286_vm10 = vcmp.eq.f32.partialorder %v2863_v3, inf }
  0xe4   :  { %1893 = vrsqrt.f32 %v2910_v27  ;;  %v976_v15 = vmul.f32 %v1884_v53, %v2791_v1  ;;  %vm288_vm9 = vcmp.eq.f32.partialorder %v2863_v3, 0.0  ;;  %v3004_v0 = vsel %vm944_vm11, %v945_v37, %v943_v22 }
  0xe5   :  { %1895 = vrsqrt.f32 %v2912_v24  ;;  %v1886_v45 = vpop.eup %1885  ;;  %v964_v53 = vsel %vm963_vm0, %v2789_v41, %v962_v56  ;;  %v289_v56 = vand.u32 2147483648, %v2863_v3  ;;  %vm300_vm0 = vcmp.eq.f32.partialorder %v2910_v27, inf }
  0xe6   :  { %v2957_v54 = vpop.xlane.xlu1 %774  ;;  %v1888_v18 = vpop.eup %1887  ;;  %v236_v39 = vmul.f32 %v1886_v45, %v2834_v2  ;;  %v978_v59 = vsel %vm977_vm14, %v2791_v1, %v976_v15  ;;  %vm302_vm14 = vcmp.eq.f32.partialorder %v2910_v27, 0.0  ;;  %v303_v21 = vand.u32 2147483648, %v2910_v27 }
  0xe7   :  { %v2955_v44 = vpop.xlane.xlu0 %765  ;;  %v983_v45 = vmul.f32 %v1888_v18, %v2832_v58  ;;  %vm307_vm15 = vcmp.eq.f32.partialorder %v2912_v24, inf  ;;  %v310_v43 = vand.u32 2147483648, %v2912_v24  ;;  %v3022_v37 = vsel %vm965_vm1, %v966_v5, %v964_v53 }
  0xe8   :  { %1897 = vrsqrt.f32 %v2955_v44  ;;  %v238_v18 = vsel %vm237_vm5, %v2834_v2, %v236_v39  ;;  %v3028_v22 = vsel %vm979_vm2, %v980_v36, %v978_v59  ;;  %vm309_vm11 = vcmp.eq.f32.partialorder %v2912_v24, 0.0 }
  0xe9   :  { %1899 = vrsqrt.f32 %v2957_v54  ;;  %v985_v39 = vsel %vm984_vm3, %v2832_v58, %v983_v45  ;;  %v3041_v41 = vsel %vm239_vm4, %v240_v57, %v238_v18  ;;  %v3831_v1 = vrot.slane %v2616_v40, %v2388_v14 }
  0xea   :  { %v1890_v32 = vpop.eup %1889  ;;  %v2988_v42 = vpop.xlane.xlu1 %161  ;;  %vm3832_vm1 = vcmask 261312   ;;  %v3833_v36 = vrot.slane %v2606_v28, %v2372_v7  ;;  %vm970_vm2 = vcmp.eq.f32.partialorder %v2955_v44, inf  ;;  %v973_v40 = vand.u32 2147483648, %v2955_v44 }
  0xeb   :  { %v1892_v48 = vpop.eup %1891  ;;  %v2986_v12 = vpop.xlane.xlu0 %152  ;;  %v264_v4 = vmul.f32 %v1890_v32, %v2861_v19  ;;  %v3048_v5 = vsel %vm3832_vm1, %v3831_v1, %v1086_v38  ;;  %vm991_vm3 = vcmp.eq.f32.partialorder %v2957_v54, inf  ;;  %v3836_v18 = vrot.slane %v2655_v8, %v2385_v13 }
  0xec   :  { %1901 = vrsqrt.f32 %v2986_v12  ;;  %v285_v32 = vmul.f32 %v1892_v48, %v2863_v3  ;;  %vm293_vm5 = vcmp.eq.f32.partialorder %v2986_v12, inf  ;;  %vm972_vm4 = vcmp.eq.f32.partialorder %v2955_v44, 0.0 }
  0xed   :  { %1903 = vrsqrt.f32 %v2988_v42  ;;  %v266_v48 = vsel %vm265_vm7, %v2861_v19, %v264_v4  ;;  %v3834_v4 = vrot.slane %v2620_v46, %v2375_v10  ;;  %vm993_vm7 = vcmp.eq.f32.partialorder %v2957_v54, 0.0 }
  0xee   :  { %v1894_v15 = vpop.eup %1893  ;;  %v3016_v61 = vpop.xlane.xlu1 %170  ;;  %v287_v2 = vsel %vm286_vm10, %v2863_v3, %v285_v32  ;;  %v3066_v28 = vsel %vm267_vm13, %v268_v16, %v266_v48  ;;  %v296_v8 = vand.u32 2147483648, %v2986_v12  ;;  %vm314_vm13 = vcmp.eq.f32.partialorder %v2988_v42, inf }
  0xef   :  { %v1896_v55 = vpop.eup %1895  ;;  %v3014_v62 = vpop.xlane.xlu0 %167  ;;  %v299_v60 = vmul.f32 %v1894_v15, %v2910_v27  ;;  %v1100_v53 = vsel %vm481_vm6, %v3834_v4, %v3833_v36  ;;  %v3835_v15 = vand.u32 2147483648, %v2832_v58  ;;  %v1109_v58 = vrot.slane %v2686_v26, %v2388_v14 }
  0xf0   :  { %1905 = vrsqrt.f32 %v3014_v62  ;;  %v306_v57 = vmul.f32 %v1896_v55, %v2912_v24  ;;  %v1105_v32 = vsel %vm488_vm12, %v3836_v18, %v1100_v53  ;;  %vm316_vm10 = vcmp.eq.f32.partialorder %v2988_v42, 0.0 }
  0xf1   :  { %1907 = vrsqrt.f32 %v3016_v61  ;;  %v3077_v55 = vsel %vm986_vm8, %v3835_v15, %v985_v39  ;;  %v301_v48 = vsel %vm300_vm0, %v2910_v27, %v299_v60  ;;  %v3093_v39 = vsel %vm288_vm9, %v289_v56, %v287_v2 }
  0xf2   :  { %v1898_v38 = vpop.eup %1897  ;;  %v3071_v45 = vpop.xlane.xlu1 %164  ;;  %vm295_vm8 = vcmp.eq.f32.partialorder %v2986_v12, 0.0  ;;  %v308_v3 = vsel %vm307_vm15, %v2912_v24, %v306_v57  ;;  %v317_v56 = vand.u32 2147483648, %v2988_v42  ;;  %v3111_v36 = vsel %vm302_vm14, %v303_v21, %v301_v48 }
  0xf3   :  { %v3069_v59 = vpop.xlane.xlu0 %777  ;;  %v1900_v19 = vpop.eup %1899  ;;  %1909 = vrsqrt.f32 %v3071_v45  ;;  %v969_v4 = vmul.f32 %v1898_v38, %v2955_v44  ;;  %vm328_vm9 = vcmp.eq.f32.partialorder %v3014_v62, inf  ;;  %v3127_v27 = vsel %vm309_vm11, %v310_v43, %v308_v3 }
  0xf4   :  { %1911 = vrsqrt.f32 %v3069_v59  ;;  %v990_v53 = vmul.f32 %v1900_v19, %v2957_v54  ;;  %3837 = vst [vmem:[#allocation4_spill] sm:$0xff] %v3127_v27  ;;  %vm330_vm0 = vcmp.eq.f32.partialorder %v3014_v62, 0.0  ;;  %v331_v21 = vand.u32 2147483648, %v3014_v62 }
  0xf5   :  { %vm335_vm14 = vcmp.eq.f32.partialorder %v3016_v61, inf  ;;  %vm337_vm15 = vcmp.eq.f32.partialorder %v3016_v61, 0.0  ;;  %v338_v48 = vand.u32 2147483648, %v3016_v61  ;;  %v971_v43 = vsel %vm970_vm2, %v2955_v44, %v969_v4 }
  0xf6   :  { %v1902_v60 = vpop.eup %1901  ;;  %v3118_v57 = vpop.xlane.xlu1 %179  ;;  %v992_v24 = vsel %vm991_vm3, %v2957_v54, %v990_v53  ;;  %vm321_vm11 = vcmp.eq.f32.partialorder %v3071_v45, inf  ;;  %vm998_vm1 = vcmp.eq.f32.partialorder %v3069_v59, inf  ;;  %vm323_vm2 = vcmp.eq.f32.partialorder %v3071_v45, 0.0 }
  0xf7   :  { %v1904_v1 = vpop.eup %1903  ;;  %v292_v2 = vmul.f32 %v1902_v60, %v2986_v12  ;;  %v3116_v15 = vpop.xlane.xlu0 %173  ;;  %vm3839_vm3 = vcmask 261312  }
  0xf8   :  { %v313_v26 = vmul.f32 %v1904_v1, %v2988_v42  ;;  %1913 = vrsqrt.f32 %v3116_v15 }
  0xf9   :  { %1915 = vrsqrt.f32 %v3118_v57  ;;  %v294_v3 = vsel %vm293_vm5, %v2986_v12, %v292_v2  ;;  %v324_v2 = vand.u32 2147483648, %v3071_v45  ;;  %v3181_v12 = vsel %vm3839_vm3, %v1109_v58, %v1105_v32 }
  0xfa   :  { %v1906_v38 = vpop.eup %1905  ;;  %v3149_v16 = vpop.xlane.xlu1 %176  ;;  %v315_v4 = vsel %vm314_vm13, %v2988_v42, %v313_v26  ;;  %v3172_v26 = vsel %vm972_vm4, %v973_v40, %v971_v43  ;;  %vm342_vm5 = vcmp.eq.f32.partialorder %v3116_v15, inf  ;;  %v345_v40 = vand.u32 2147483648, %v3116_v15 }
  0xfb   :  { %v1908_v60 = vpop.eup %1907  ;;  %v327_v1 = vmul.f32 %v1906_v38, %v3014_v62  ;;  %v3147_v19 = vpop.xlane.xlu0 %182  ;;  %v3164_v38 = vsel %vm295_vm8, %v296_v8, %v294_v3  ;;  %v3185_v3 = vsel %vm316_vm10, %v317_v56, %v315_v4  ;;  %vm344_vm4 = vcmp.eq.f32.partialorder %v3116_v15, 0.0 }
  0xfc   :  { %v334_v46 = vmul.f32 %v1908_v60, %v3016_v61  ;;  %1917 = vrsqrt.f32 %v3147_v19  ;;  %v3838_v60 = vand.u32 2147483648, %v2957_v54  ;;  %3840 = vst [vmem:[#allocation5_spill] sm:$0xff] %v3185_v3  ;;  %vm358_vm8 = vcmp.eq.f32.partialorder %v3118_v57, 0.0 }
  0xfd   :  { %1919 = vrsqrt.f32 %v3149_v16  ;;  %v1910_v8 = vpop.eup %1909  ;;  %v329_v44 = vsel %vm328_vm9, %v3014_v62, %v327_v1  ;;  %v359_v56 = vand.u32 2147483648, %v3118_v57  ;;  %vm1000_vm13 = vcmp.eq.f32.partialorder %v3069_v59, 0.0 }
  0xfe   :  { %v3178_v18 = vsel %vm993_vm7, %v3838_v60, %v992_v24  ;;  %v3194_v54 = vpop.xlane.xlu1 %191  ;;  %v1912_v24 = vpop.eup %1911  ;;  %v336_v32 = vsel %vm335_vm14, %v3016_v61, %v334_v46  ;;  %v320_v42 = vmul.f32 %v1910_v8, %v3071_v45  ;;  %vm356_vm7 = vcmp.eq.f32.partialorder %v3118_v57, inf }
  0xff   :  { %v3192_v43 = vpop.xlane.xlu0 %185  ;;  %v3213_v4 = vsel %vm330_vm0, %v331_v21, %v329_v44  ;;  %vm363_vm10 = vcmp.eq.f32.partialorder %v3147_v19, inf  ;;  %v3841_v60 = vrot.slane %v2644_v50, %v2372_v7  ;;  %v3842_v8 = vrot.slane %v2690_v52, %v2375_v10 }
 0x100   :  { %1921 = vrsqrt.f32 %v3192_v43  ;;  %v3227_v27 = vsel %vm337_vm15, %v338_v48, %v336_v32  ;;  %v997_v62 = vmul.f32 %v1912_v24, %v3069_v59  ;;  %vm365_vm9 = vcmp.eq.f32.partialorder %v3147_v19, 0.0 }
 0x101   :  { %1923 = vrsqrt.f32 %v3194_v54  ;;  %v3223_v58 = vsel %vm481_vm6, %v3842_v8, %v3841_v60  ;;  %3843 = vst [vmem:[#allocation6_spill] sm:$0xff] %v3227_v27  ;;  %v322_v52 = vsel %vm321_vm11, %v3071_v45, %v320_v42  ;;  %v366_v61 = vand.u32 2147483648, %v3147_v19 }
 0x102   :  { %v1914_v46 = vpop.eup %1913  ;;  %v3234_v50 = vpop.xlane.xlu1 %188  ;;  %vm349_vm0 = vcmp.eq.f32.partialorder %v3149_v16, inf  ;;  %vm351_vm14 = vcmp.eq.f32.partialorder %v3149_v16, 0.0  ;;  %v352_v42 = vand.u32 2147483648, %v3149_v16  ;;  %vm370_vm15 = vcmp.eq.f32.partialorder %v3192_v43, inf }
 0x103   :  { %v1916_v53 = vpop.eup %1915  ;;  %v341_v21 = vmul.f32 %v1914_v46, %v3116_v15  ;;  %v3232_v44 = vpop.xlane.xlu0 %194  ;;  %v3256_v8 = vsel %vm323_vm2, %v324_v2, %v322_v52  ;;  %vm372_vm11 = vcmp.eq.f32.partialorder %v3192_v43, 0.0  ;;  %v999_v3 = vsel %vm998_vm1, %v3069_v59, %v997_v62 }
 0x104   :  { %v355_v60 = vmul.f32 %v1916_v53, %v3118_v57  ;;  %1925 = vrsqrt.f32 %v3232_v44  ;;  %v373_v2 = vand.u32 2147483648, %v3192_v43  ;;  %vm384_vm2 = vcmp.eq.f32.partialorder %v3194_v54, inf }
 0x105   :  { %1927 = vrsqrt.f32 %v3234_v50  ;;  %v343_v53 = vsel %vm342_vm5, %v3116_v15, %v341_v21  ;;  %vm3822_vm1 = vcmask 1041409   ;;  %vm632_vm3 = vcmask 1042434  }
 0x106   :  { %v1918_v24 = vpop.eup %1917  ;;  %v357_v1 = vsel %vm356_vm7, %v3118_v57, %v355_v60  ;;  %v3265_v21 = vpop.xlane.xlu1 %203  ;;  %v3276_v52 = vsel %vm344_vm4, %v345_v40, %v343_v53  ;;  %v3844_v15 = vand.u32 2147483648, %v3069_v59  ;;  %vm391_vm5 = vcmp.eq.f32.partialorder %v3232_v44, inf }
 0x107   :  { %v1920_v46 = vpop.eup %1919  ;;  %v362_v48 = vmul.f32 %v1918_v24, %v3147_v19  ;;  %v3263_v32 = vpop.xlane.xlu0 %197  ;;  %v3287_v27 = vsel %vm358_vm8, %v359_v56, %v357_v1  ;;  %vm3825_vm4 = vcmask 1043459   ;;  %vm3824_vm7 = vcmask 1044484  }
 0x108   :  { %v348_v45 = vmul.f32 %v1920_v46, %v3149_v16  ;;  %1929 = vrsqrt.f32 %v3263_v32  ;;  %v3293_v40 = vsel %vm1000_vm13, %v3844_v15, %v999_v3  ;;  %vm386_vm13 = vcmp.eq.f32.partialorder %v3194_v54, 0.0 }
 0x109   :  { %v364_v60 = vsel %vm363_vm10, %v3147_v19, %v362_v48  ;;  %1931 = vrsqrt.f32 %v3265_v21  ;;  %v1123_v48 = vrot.slane %v2750_v25, %v2385_v13  ;;  %v394_v25 = vand.u32 2147483648, %v3232_v44 }
 0x10a   :  { %v1922_v62 = vpop.eup %1921  ;;  %v3299_v24 = vsel %vm365_vm9, %v366_v61, %v364_v60  ;;  %v350_v57 = vsel %vm349_vm0, %v3149_v16, %v348_v45  ;;  %v380_v19 = vand.u32 2147483648, %v3234_v50  ;;  %v1128_v45 = vrot.slane %v2853_v9, %v2388_v14 }
 0x10b   :  { %v1924_v53 = vpop.eup %1923  ;;  %v369_v56 = vmul.f32 %v1922_v62, %v3192_v43  ;;  %v1137_v60 = vrot.slane %v2772_v63, %v2375_v10  ;;  %v401_v1 = vand.u32 2147483648, %v3263_v32  ;;  %vm393_vm9 = vcmp.eq.f32.partialorder %v3232_v44, 0.0 }
 0x10c   :  { %v383_v3 = vmul.f32 %v1924_v53, %v3194_v54  ;;  %v3324_v53 = vsel %vm351_vm14, %v352_v42, %v350_v57  ;;  %vm377_vm0 = vcmp.eq.f32.partialorder %v3234_v50, inf  ;;  %v415_v63 = vand.u32 2147483648, %v3265_v21 }
 0x10d   :  { %v371_v61 = vsel %vm370_vm15, %v3192_v43, %v369_v56  ;;  %v1142_v56 = vrot.slane %v2867_v17, %v2385_v13  ;;  %v1124_v16 = vsel %vm488_vm12, %v1123_v48, %v3223_v58  ;;  %v1133_v42 = vrot.slane %v2729_v47, %v2372_v7  ;;  %v3350_v48 = vpop.xlane.xlu0 %206 }
 0x10e   :  { %v1926_v62 = vpop.eup %1925  ;;  %v3340_v57 = vsel %vm372_vm11, %v373_v2, %v371_v61  ;;  %v385_v17 = vsel %vm384_vm2, %v3194_v54, %v383_v3  ;;  %vm398_vm14 = vcmp.eq.f32.partialorder %v3263_v32, inf  ;;  %vm3823_vm10 = vcmask 261120   ;;  %v3359_v61 = vpop.xlane.xlu1 %200 }
 0x10f   :  { %v1928_v9 = vpop.eup %1927  ;;  %v390_v46 = vmul.f32 %v1926_v62, %v3232_v44  ;;  %v1147_v62 = vrot.slane %v3004_v0, %v2388_v14  ;;  %v1156_v58 = vrot.slane %v2918_v34, %v2375_v10  ;;  %vm412_vm15 = vcmp.eq.f32.partialorder %v3265_v21, inf }
 0x110   :  { %vm3845_vm8 = vcmask 261312   ;;  %v1138_v43 = vsel %vm481_vm6, %v1137_v60, %v1133_v42  ;;  %v1152_v2 = vrot.slane %v2888_v29, %v2372_v7  ;;  %v1161_v3 = vrot.slane %v3022_v37, %v2385_v13 }
 0x111   :  { %v1129_v47 = vsel %vm3845_vm8, %v1128_v45, %v1124_v16  ;;  %v376_v15 = vmul.f32 %v1928_v9, %v3234_v50  ;;  %v1143_v34 = vsel %vm488_vm12, %v1142_v56, %v1138_v43  ;;  %v1166_v59 = vrot.slane %v3172_v26, %v2388_v14  ;;  %vm3846_vm11 = vmmov %vm3845_vm8 }
 0x112   :  { %v1930_v0 = vpop.eup %1929  ;;  %v1175_v45 = vrot.slane %v3077_v55, %v2375_v10  ;;  %v392_v29 = vsel %vm391_vm5, %v3232_v44, %v390_v46  ;;  %v1171_v37 = vrot.slane %v3028_v22, %v2372_v7  ;;  %v1180_v16 = vrot.slane %v3178_v18, %v2385_v13 }
 0x113   :  { %v1932_v60 = vpop.eup %1931  ;;  %v1185_v56 = vrot.slane %v3293_v40, %v2388_v14  ;;  %v1148_v9 = vsel %vm3846_vm11, %v1147_v62, %v1143_v34  ;;  %v1157_v26 = vsel %vm481_vm6, %v1156_v58, %v1152_v2  ;;  %v1187_v55 = vsel %vm3822_vm1, %v2936_v51, %v2797_v49  ;;  %v3395_v58 = vpop.xlane.xlu0 %209  ;;  %vm3848_vm1 = vmmov %vm3846_vm11 }
 0x114   :  { %1933 = vrsqrt.f32 %v3350_v48  ;;  %vm379_vm2 = vcmp.eq.f32.partialorder %v3234_v50, 0.0  ;;  %v397_v22 = vmul.f32 %v1930_v0, %v3263_v32  ;;  %vm400_vm5 = vcmp.eq.f32.partialorder %v3263_v32, 0.0 }
 0x115   :  { %vm414_vm8 = vcmp.eq.f32.partialorder %v3265_v21, 0.0  ;;  %v1162_v18 = vsel %vm488_vm12, %v1161_v3, %v1157_v26  ;;  %v1176_v46 = vsel %vm481_vm6, %v1175_v45, %v1171_v37  ;;  %v1188_v40 = vsel %vm632_vm3, %v3048_v5, %v1187_v55  ;;  %v1945_v26 = vld [vmem:[%s3810_s2 + $0x80] sm:$0xff] }
 0x116   :  { %v411_v42 = vmul.f32 %v1932_v60, %v3265_v21  ;;  %v1167_v49 = vsel %vm3846_vm11, %v1166_v59, %v1162_v18  ;;  %v1181_v51 = vsel %vm488_vm12, %v1180_v16, %v1176_v46  ;;  %v1189_v62 = vsel %vm3825_vm4, %v3181_v12, %v1188_v40  ;;  %v3406_v59 = vpop.xlane.xlu1 %212  ;;  %v1947_v46 = vld [vmem:[%s3810_s2 + $0xa0] sm:$0xff] }
 0x117   :  { %v3847_v43 = vand.u32 2147483648, %v3194_v54  ;;  %v1186_v3 = vsel %vm3848_vm1, %v1185_v56, %v1181_v51  ;;  %v1190_v5 = vsel %vm3824_vm7, %v1129_v47, %v1189_v62  ;;  %1935 = vrsqrt.f32 %v3359_v61  ;;  %v1943_v47 = vld [vmem:[%s3810_s2 + $0x60] sm:$0xff]  ;;  %v1949_v51 = vld [vmem:[%s3810_s2 + $0x98] sm:$0xff] }
 0x118   :  { %v3412_v12 = vsel %vm393_vm9, %v394_v25, %v392_v29  ;;  %v378_v54 = vsel %vm377_vm0, %v3234_v50, %v376_v15  ;;  %vm3850_vm1 = vcmask 130048   ;;  %v399_v34 = vsel %vm398_vm14, %v3263_v32, %v397_v22  ;;  %v1944_v29 = vld [vmem:[%s3810_s2 + $0x58] sm:$0xff] }
 0x119   :  { %v3401_v2 = vsel %vm386_vm13, %v3847_v43, %v385_v17  ;;  %vm3849_vm13 = vcmask 1045509   ;;  %v1235_v0 = vsel %vm3850_vm1, %v1943_v47, 0.0  ;;  %vm3851_vm11 = vcmask 1046534   ;;  %v1946_v22 = vld [vmem:[%s3810_s2 + $0x78] sm:$0xff]  ;;  %vm3856_vm7 = vmmov %vm3850_vm1 }
 0x11a   :  { %v1191_v17 = vsel %vm3849_vm13, %v1148_v9, %v1190_v5  ;;  %vm419_vm9 = vcmp.eq.f32.partialorder %v3350_v48, inf  ;;  %1236 = vadd.xlane.f32.xlu1 %v1235_v0  ;;  %1937 = vrsqrt.f32 %v3395_v58  ;;  %v413_v25 = vsel %vm412_vm15, %v3265_v21, %v411_v42  ;;  %v1948_v42 = vld [vmem:[%s3810_s2 + $0xb0] sm:$0xff] }
 0x11b   :  { %v1192_v44 = vsel %vm3851_vm11, %v1167_v49, %v1191_v17  ;;  %vm3852_vm0 = vcmask 1047559   ;;  %vm421_vm13 = vcmp.eq.f32.partialorder %v3350_v48, 0.0  ;;  %1939 = vrsqrt.f32 %v3406_v59  ;;  %vm3853_vm11 = vmmov %vm3850_vm1 }
 0x11c   :  { %v1193_v15 = vsel %vm3852_vm0, %v1186_v3, %v1192_v44  ;;  %v422_v60 = vand.u32 2147483648, %v3350_v48  ;;  %vm405_vm14 = vcmp.eq.f32.partialorder %v3359_v61, inf  ;;  %v1232_v37 = vsel %vm3850_vm1, %v1944_v29, 0.0  ;;  %v1950_v3 = vld [vmem:[%s3810_s2 + $0xc8] sm:$0xff] }
 0x11d   :  { %v1195_v45 = vsel %vm3823_vm10, %v1193_v15, 0.0  ;;  %vm407_vm15 = vcmp.eq.f32.partialorder %v3359_v61, 0.0  ;;  %v408_v16 = vand.u32 2147483648, %v3359_v61  ;;  %v429_v56 = vand.u32 2147483648, %v3395_v58  ;;  %vm3854_vm10 = vmmov %vm3850_vm1 }
 0x11e   :  { %1196 = vadd.xlane.f32.xlu0 %v1195_v45  ;;  %v436_v9 = vand.u32 2147483648, %v3406_v59  ;;  %v1247_v55 = vsel %vm3853_vm11, %v1945_v26, 0.0  ;;  %vm426_vm0 = vcmp.eq.f32.partialorder %v3395_v58, inf  ;;  %1233 = vadd.xlane.f32.xlu1 %v1232_v37  ;;  %v1244_v18 = vsel %vm3850_vm1, %v1946_v22, 0.0  ;;  %vm3855_vm11 = vmmov %vm3850_vm1  ;;  %v1934_v43 = vpop.eup %1933 }
 0x11f   :  { %v1259_v40 = vsel %vm3854_vm10, %v1947_v46, 0.0  ;;  %v1265_v49 = vsel %vm3855_vm11, %v1948_v42, 0.0  ;;  %v3466_v62 = vsel %vm3856_vm7, %v1949_v51, 0.0  ;;  %vm428_vm1 = vcmp.eq.f32.partialorder %v3395_v58, 0.0  ;;  %vm3857_vm10 = vmmov %vm3856_vm7  ;;  %v3874_v46 = vld [vmem:[#allocation4_spill] sm:$0xff]  ;;  %v3877_v51 = vld [vmem:[#allocation6_spill] sm:$0xff] }
 0x120   :  { %vm433_vm4 = vcmp.eq.f32.partialorder %v3406_v59, inf  ;;  %v1274_v5 = vsel %vm3857_vm10, %v1950_v3, 0.0  ;;  %v381_v17 = vsel %vm379_vm2, %v380_v19, %v378_v54  ;;  %v402_v47 = vsel %vm400_vm5, %v401_v1, %v399_v34 }
 0x121   :  { %v416_v0 = vsel %vm414_vm8, %v415_v63, %v413_v25  ;;  %v418_v44 = vmul.f32 %v1934_v43, %v3350_v48  ;;  %v3858_v15 = vrot.slane %v2759_v31, %v2372_v7  ;;  %v3859_v45 = vrot.slane %v2776_v33, %v2375_v10  ;;  %v1936_v34 = vpop.eup %1935 }
 0x122   :  { %v3860_v19 = vrot.slane %v2782_v20, %v2372_v7  ;;  %v3861_v32 = vrot.slane %v2820_v23, %v2375_v10  ;;  %v3862_v21 = vrot.slane %v2942_v35, %v2372_v7  ;;  %v3863_v63 = vrot.slane %v2963_v30, %v2375_v10  ;;  %1266 = vadd.xlane.f32.xlu0 %v1265_v49 }
 0x123   :  { %v482_v50 = vsel %vm481_vm6, %v3859_v45, %v3858_v15  ;;  %vm435_vm7 = vcmp.eq.f32.partialorder %v3406_v59, 0.0  ;;  %v3864_v33 = vrot.slane %v2903_v6, %v2385_v13  ;;  %v3865_v23 = vrot.slane %v2926_v11, %v2385_v13  ;;  %1248 = vadd.xlane.f32.xlu1 %v1247_v55 }
 0x124   :  { %v505_v1 = vsel %vm481_vm6, %v3861_v32, %v3860_v19  ;;  %v524_v31 = vsel %vm481_vm6, %v3863_v63, %v3862_v21  ;;  %v3866_v35 = vrot.slane %v3093_v39, %v2385_v13  ;;  %v420_v25 = vsel %vm419_vm9, %v3350_v48, %v418_v44  ;;  %v1938_v3 = vpop.eup %1937  ;;  %v3879_v44 = vld [vmem:[#allocation5_spill] sm:$0xff] }
 0x125   :  { %v489_v20 = vsel %vm488_vm12, %v3864_v33, %v482_v50  ;;  %v510_v54 = vsel %vm488_vm12, %v3865_v23, %v505_v1  ;;  %v3867_v6 = vrot.slane %v3041_v41, %v2388_v14  ;;  %vm3868_vm2 = vcmask 261312   ;;  %v1940_v19 = vpop.eup %1939 }
 0x126   :  { %v529_v30 = vsel %vm488_vm12, %v3866_v35, %v524_v31  ;;  %v3869_v11 = vrot.slane %v3066_v28, %v2388_v14  ;;  %vm3870_vm5 = vmmov %vm3868_vm2  ;;  %v571_v39 = vrot.slane %v3324_v53, %v2388_v14  ;;  %v404_v26 = vmul.f32 %v1936_v34, %v3359_v61  ;;  %1275 = vadd.xlane.f32.xlu0 %v1274_v5  ;;  %v1951_v35 = vld [vmem:[%s3810_s2 + $0xd0] sm:$0xff] }
 0x127   :  { %v496_v29 = vsel %vm3868_vm2, %v3867_v6, %v489_v20  ;;  %v3871_v22 = vrot.slane %v3164_v38, %v2388_v14  ;;  %vm3872_vm8 = vmmov %vm3868_vm2  ;;  %v3873_v41 = vrot.slane %v3111_v36, %v2372_v7  ;;  %v3875_v42 = vrot.slane %v3874_v46, %v2375_v10  ;;  %1245 = vadd.xlane.f32.xlu1 %v1244_v18 }
 0x128   :  { %v515_v37 = vsel %vm3870_vm5, %v3869_v11, %v510_v54  ;;  %v3876_v49 = vrot.slane %v3213_v4, %v2372_v7  ;;  %v3878_v53 = vrot.slane %v3877_v51, %v2375_v10  ;;  %v423_v38 = vsel %vm421_vm13, %v422_v60, %v420_v25  ;;  %vm3883_vm9 = vmmov %vm3868_vm2 }
 0x129   :  { %v534_v55 = vsel %vm3872_vm8, %v3871_v22, %v529_v30  ;;  %v543_v28 = vsel %vm481_vm6, %v3875_v42, %v3873_v41  ;;  %v3880_v36 = vrot.slane %v3879_v44, %v2385_v13  ;;  %v3881_v45 = vrot.slane %v3276_v52, %v2385_v13  ;;  %vm3884_vm13 = vmmov %vm3868_vm2  ;;  %v1953_v41 = vld [vmem:[%s3810_s2 + $0xf0] sm:$0xff]  ;;  %v1958_v44 = vld [vmem:[%s3810_s2 + $0xf8] sm:$0xff] }
 0x12a   :  { %v562_v43 = vsel %vm481_vm6, %v3878_v53, %v3876_v49  ;;  %v585_v4 = vrot.slane %v3340_v57, %v2385_v13  ;;  %v406_v32 = vsel %vm405_vm14, %v3359_v61, %v404_v26  ;;  %v425_v48 = vmul.f32 %v1938_v3, %v3395_v58  ;;  %vm3888_vm14 = vmmov %vm3857_vm10  ;;  %v1955_v49 = vld [vmem:[%s3810_s2 + $0xb8] sm:$0xff]  ;;  %v1956_v53 = vld [vmem:[%s3810_s2 + $0xe0] sm:$0xff] }
 0x12b   :  { %v548_v15 = vsel %vm488_vm12, %v3880_v36, %v543_v28  ;;  %v567_v50 = vsel %vm488_vm12, %v3881_v45, %v562_v43  ;;  %v3882_v60 = vrot.slane %v3256_v8, %v2388_v14  ;;  %v432_v21 = vmul.f32 %v1940_v19, %v3406_v59  ;;  %1260 = vadd.xlane.f32.xlu1 %v1259_v40  ;;  %v1957_v3 = vld [vmem:[%s3810_s2 + $0xd8] sm:$0xff]  ;;  %v1201_v45 = vpop.xlane.xlu0 %1200 }
 0x12c   :  { %v572_v52 = vsel %vm3884_vm13, %v571_v39, %v567_v50  ;;  %v409_v57 = vsel %vm407_vm15, %v408_v16, %v406_v32  ;;  %v3885_v63 = vrot.slane %v3287_v27, %v2372_v7  ;;  %v3886_v31 = vrot.slane %v3299_v24, %v2375_v10  ;;  %vm3889_vm15 = vmmov %vm3868_vm2  ;;  %v1204_v32 = vpop.xlane.xlu1 %1203 }
 0x12d   :  { %v553_v1 = vsel %vm3883_vm9, %v3882_v60, %v548_v15  ;;  %v599_v8 = vrot.slane %v3412_v12, %v2375_v10  ;;  %v427_v33 = vsel %vm426_vm0, %v3395_v58, %v425_v48  ;;  %v590_v18 = vrot.slane %v381_v17, %v2388_v14  ;;  %vm3890_vm0 = vmmov %vm3868_vm2 }
 0x12e   :  { %v581_v5 = vsel %vm481_vm6, %v3886_v31, %v3885_v63  ;;  %v595_v61 = vrot.slane %v3401_v2, %v2372_v7  ;;  %v604_v16 = vrot.slane %v402_v47, %v2385_v13  ;;  %v430_v27 = vsel %vm428_vm1, %v429_v56, %v427_v33  ;;  %vm3892_vm1 = vmmov %vm3857_vm10 }
 0x12f   :  { %v434_v24 = vsel %vm433_vm4, %v3406_v59, %v432_v21  ;;  %v586_v12 = vsel %vm488_vm12, %v585_v4, %v581_v5  ;;  %v609_v20 = vrot.slane %v409_v57, %v2388_v14  ;;  %v614_v2 = vrot.slane %v416_v0, %v2372_v7  ;;  %vm3893_vm10 = vmmov %vm3890_vm0  ;;  %1257 = vadd.xlane.f32.xlu1 %v3466_v62  ;;  %v1954_v62 = vld [vmem:[%s3810_s2 + $0xc0] sm:$0xff]  ;;  %v1213_v50 = vpop.xlane.xlu0 %1212 }
 0x130   :  { %v437_v17 = vsel %vm435_vm7, %v436_v9, %v434_v24  ;;  %v618_v47 = vrot.slane %v423_v38, %v2375_v10  ;;  %v623_v58 = vrot.slane %v430_v27, %v2385_v13  ;;  %v600_v56 = vsel %vm481_vm6, %v599_v8, %v595_v61  ;;  %vm3898_vm9 = vmmov %vm3892_vm1  ;;  %v1216_v60 = vpop.xlane.xlu1 %1215 }
 0x131   :  { %v628_v23 = vrot.slane %v437_v17, %v2388_v14  ;;  %vm3887_vm4 = vcmask 1041409   ;;  %v1277_v59 = vsel %vm3888_vm14, %v1951_v35, 0.0  ;;  %v591_v9 = vsel %vm3889_vm15, %v590_v18, %v586_v12  ;;  %vm3901_vm14 = vmmov %vm3892_vm1  ;;  %v3905_v35 = vld [vmem:[#allocation3_spill] sm:$0xff] }
 0x132   :  { %v631_v54 = vsel %vm3887_vm4, %v515_v37, %v496_v29  ;;  %v605_v0 = vsel %vm488_vm12, %v604_v16, %v600_v56  ;;  %v619_v30 = vsel %vm481_vm6, %v618_v47, %v614_v2  ;;  %1278 = vadd.xlane.f32.xlu0 %v1277_v59  ;;  %vm3891_vm11 = vcmask 1043459   ;;  %v1952_v29 = vld [vmem:[%s3810_s2 + $0xe8] sm:$0xff]  ;;  %vm3900_vm4 = vmmov %vm3892_vm1 }
 0x133   :  { %v633_v40 = vsel %vm632_vm3, %v534_v55, %v631_v54  ;;  %v610_v34 = vsel %vm3890_vm0, %v609_v20, %v605_v0  ;;  %v624_v25 = vsel %vm488_vm12, %v623_v58, %v619_v30  ;;  %v1286_v11 = vsel %vm3892_vm1, %v1952_v29, 0.0  ;;  %vm3902_vm15 = vmmov %vm3892_vm1  ;;  %v1207_v4 = vpop.xlane.xlu0 %1206 }
 0x134   :  { %v635_v6 = vsel %vm3891_vm11, %v553_v1, %v633_v40  ;;  %v629_v37 = vsel %vm3893_vm10, %v628_v23, %v624_v25  ;;  %vm3894_vm7 = vcmask 1044484   ;;  %vm3895_vm2 = vcmask 1045509   ;;  %vm3903_vm0 = vmmov %vm3892_vm1 }
 0x135   :  { %v637_v39 = vsel %vm3894_vm7, %v572_v52, %v635_v6  ;;  %vm3896_vm5 = vcmask 1046534   ;;  %vm3897_vm8 = vcmask 1047559   ;;  %v1289_v46 = vsel %vm3898_vm9, %v1953_v41, 0.0  ;;  %vm3904_vm11 = vmmov %vm3903_vm0  ;;  %v1219_v52 = vpop.xlane.xlu1 %1218 }
 0x136   :  { %v639_v26 = vsel %vm3895_vm2, %v591_v9, %v637_v39  ;;  %1287 = vadd.xlane.f32.xlu0 %v1286_v11  ;;  %vm3899_vm13 = vcmask 261120   ;;  %v1271_v28 = vsel %vm3900_vm4, %v1954_v62, 0.0  ;;  %v1268_v51 = vsel %vm3901_vm14, %v1955_v49, 0.0  ;;  %vm3906_vm7 = vmmov %vm3893_vm10 }
 0x137   :  { %v641_v22 = vsel %vm3896_vm5, %v610_v34, %v639_v26  ;;  %v1283_v43 = vsel %vm3902_vm15, %v1956_v53, 0.0  ;;  %v1280_v38 = vsel %vm3903_vm0, %v1957_v3, 0.0  ;;  %v1292_v36 = vsel %vm3904_vm11, %v1958_v44, 0.0  ;;  %v3656_v19 = vpop.xlane.xlu0 %1224  ;;  %vm3907_vm2 = vmmov %vm3906_vm7 }
 0x138   :  { %v643_v55 = vsel %vm3897_vm8, %v629_v37, %v641_v22  ;;  %v1959_v15 = vmov 0   ;;  %v1330_v58 = vstv %s3812_s0  ;;  %v1338_v59 = vsub.s32 0, %v3905_v35  ;;  %vm3908_vm5 = vmmov %vm3907_vm2 }
 0x139   :  { %v646_v42 = vsel %vm3899_vm13, %v643_v55, 0.0  ;;  %1812 = vset.pattern.permute.xlu1 %v1959_v15  ;;  %1811 = vset.pattern.permute.xlu0 %v1959_v15  ;;  %v3664_v57 = vpop.xlane.xlu1 %1227  ;;  %v1342_v30 = vsub.s32 1, %v3905_v35  ;;  %v1296_v34 = vmul.f32 0.0625, %v1201_v45  ;;  %v1297_v25 = vmul.f32 0.0625, %v1204_v32  ;;  %vm3910_vm9 = vmmov %vm3907_vm2 }
 0x13a   :  { %647 = vadd.xlane.f32.xlu1 %v646_v42  ;;  %1290 = vadd.xlane.f32.xlu0 %v1289_v46  ;;  %v1350_v37 = vsub.s32 3, %v3905_v35  ;;  %v1300_v39 = vmul.f32 0.0625, %v1213_v50  ;;  %v1346_v46 = vsub.s32 2, %v3905_v35  ;;  %v1301_v42 = vmul.f32 0.0625, %v1216_v60  ;;  %vm3911_vm13 = vmmov %vm3907_vm2 }
 0x13b   :  { %v3658_v48 = vpop.xlane.xlu0 %1209  ;;  %v1354_v53 = vsub.s32 4, %v3905_v35  ;;  %v1302_v15 = vmul.f32 0.0625, %v1219_v52  ;;  %v1358_v50 = vsub.s32 5, %v3905_v35  ;;  %vm1961_vm1 = vmmov 0   ;;  %vm3913_vm14 = vmmov %vm3907_vm2 }
 0x13c   :  { %vm3909_vm8 = vcmask 1041409   ;;  %vm3912_vm4 = vcmask 1043459   ;;  %vm3914_vm15 = vcmask 1044484   ;;  %vm3916_vm0 = vmmov %vm3907_vm2  ;;  %vm3917_vm11 = vcmask 1046534  }
 0x13d   :  { %v1222_v31 = vpop.xlane.xlu1 %1221 }
 0x13e   :  { %1272 = vadd.xlane.f32.xlu1 %v1271_v28  ;;  %v1303_v26 = vmul.f32 0.0625, %v1222_v31 }
 0x13f   :  { %v3660_v1 = vpop.xlane.xlu0 %1230 }
 0x142   :  { %1269 = vadd.xlane.f32.xlu1 %v1268_v51 }
 0x143   :  { %v3662_v21 = vpop.xlane.xlu0 %1239 }
 0x146   :  { %1284 = vadd.xlane.f32.xlu1 %v1283_v43  ;;  %v1298_v43 = vmul.f32 0.0625, %v1207_v4  ;;  %v1304_v4 = vmul.f32 0.0625, %v3656_v19 }
 0x147   :  { %v3666_v63 = vpop.xlane.xlu0 %1242 }
 0x14a   :  { %1281 = vadd.xlane.f32.xlu1 %v1280_v38 }
 0x14b   :  { %v3668_v5 = vpop.xlane.xlu0 %1251 }
 0x14e   :  { %1293 = vadd.xlane.f32.xlu1 %v1292_v36 }
 0x14f   :  { %v3670_v33 = vpop.xlane.xlu0 %1254 }
 0x153   :  { %v3672_v16 = vpop.xlane.xlu0 %1263 }
 0x1a7   :  { %v1237_v8 = vpop.xlane.xlu1 %1236 }
 0x1a8   :  { %v1308_v62 = vmul.f32 0.0625, %v1237_v8 }
 0x1ab   :  { %v1234_v18 = vpop.xlane.xlu1 %1233  ;;  %v1197_v24 = vpop.xlane.xlu0 %1196 }
 0x1ac   :  { %v1198_v20 = vmul.f32 0.03125, %v1197_v24  ;;  %v1307_v3 = vmul.f32 0.0625, %v1234_v18 }
 0x1ae   :  { %1941 = vrcp.f32 %v1198_v20 }
 0x1b0   :  { %v1249_v61 = vpop.xlane.xlu1 %1248 }
 0x1b1   :  { %v1312_v45 = vmul.f32 0.0625, %v1249_v61  ;;  %v1305_v61 = vmul.f32 0.0625, %v3664_v57 }
 0x1b4   :  { %v1246_v27 = vpop.xlane.xlu1 %1245 }
 0x1b5   :  { %v1311_v8 = vmul.f32 0.0625, %v1246_v27  ;;  %v1299_v27 = vmul.f32 0.0625, %v3658_v48  ;;  %v1309_v48 = vmul.f32 0.0625, %v3662_v21 }
 0x1b8   :  { %v1261_v12 = vpop.xlane.xlu1 %1260  ;;  %v1942_v9 = vpop.eup %1941 }
 0x1bc   :  { %v3674_v17 = vpop.xlane.xlu1 %1257 }
 0x1c7   :  { %v648_v2 = vpop.xlane.xlu1 %647 }
 0x1c8   :  { %v650_v47 = vmul.f32 0.03125, %v648_v2 }
 0x1ca   :  { %v1329_v56 = vsub.f32 %v1198_v20, %v650_v47  ;;  %v1362_v47 = vsub.s32 6, %v3905_v35 }
 0x1cb   :  { %v1273_v31 = vpop.xlane.xlu1 %1272 }
 0x1cc   :  { %v1331_v23 = vmul.f32 %v1330_v58, %v1329_v56  ;;  %v1315_v56 = vmul.f32 0.0625, %v3674_v17  ;;  %v1366_v17 = vsub.s32 7, %v3905_v35 }
 0x1ce   :  { %v1332_v54 = vsub.f32 %v1198_v20, %v1331_v23  ;;  %v1316_v20 = vmul.f32 0.0625, %v1261_v12 }
 0x1cf   :  { %v1270_v2 = vpop.xlane.xlu1 %1269 }
 0x1d0   :  { %v3680_v0 = vmul.f32 %v1942_v9, %v1332_v54  ;;  %v1320_v54 = vmul.f32 0.0625, %v1273_v31  ;;  %v1306_v9 = vmul.f32 0.0625, %v3660_v1  ;;  %v1408_v31 = vld [vmem:[%s3813_s3] sm:$0xff] }
 0x1d2   :  { %v1339_v40 = vrot.slane %v3680_v0, %v1338_v59  ;;  %v1343_v11 = vrot.slane %v3680_v0, %v1342_v30  ;;  %v3687_v41 = vrot.slane %v3680_v0, %v1350_v37  ;;  %v1347_v51 = vrot.slane %v3680_v0, %v1346_v46 }
 0x1d3   :  { %v3694_v36 = vrot.slane %v3680_v0, %v1354_v53  ;;  %v3700_v18 = vrot.slane %v3680_v0, %v1358_v50  ;;  %v1363_v23 = vrot.slane %v3680_v0, %v1362_v47  ;;  %v1285_v12 = vpop.xlane.xlu1 %1284  ;;  %v1310_v37 = vmul.f32 0.0625, %v3666_v63 }
 0x1d4   :  { %v1377_v6 = vmul.f32 %v1339_v40, %v1297_v25  ;;  %v1376_v29 = vmul.f32 %v1339_v40, %v1296_v34  ;;  %v1380_v22 = vmul.f32 %v1343_v11, %v1300_v39  ;;  %v1383_v55 = vmul.f32 %v1343_v11, %v1303_v26 }
 0x1d5   :  { %v1381_v28 = vmul.f32 %v1343_v11, %v1301_v42  ;;  %v1388_v49 = vmul.f32 %v3687_v41, %v1308_v62  ;;  %v1378_v38 = vmul.f32 %v1339_v40, %v1298_v43  ;;  %v1387_v44 = vmul.f32 %v1347_v51, %v1307_v3 }
 0x1d6   :  { %1455 = vperm.xlu1 %1812, %v1377_v6   ;;  %1452 = vperm.xlu0 %1811, %v1376_v29   ;;  %v1382_v32 = vmul.f32 %v1343_v11, %v1302_v15  ;;  %v1392_v60 = vmul.f32 %v3694_v36, %v1312_v45  ;;  %v1384_v24 = vmul.f32 %v1347_v51, %v1304_v4  ;;  %v1319_v34 = vmul.f32 0.0625, %v1270_v2  ;;  %v1409_v4 = vld [vmem:[%s3813_s3 + $0x8] sm:$0xff] }
 0x1d7   :  { %v1391_v52 = vmul.f32 %v3687_v41, %v1311_v8  ;;  %v1385_v58 = vmul.f32 %v1347_v51, %v1305_v61  ;;  %v1396_v19 = vmul.f32 %v3700_v18, %v1316_v20  ;;  %v1379_v59 = vmul.f32 %v1339_v40, %v1299_v27  ;;  %v1282_v6 = vpop.xlane.xlu1 %1281 }
 0x1d8   :  { %v1395_v57 = vmul.f32 %v3694_v36, %v1315_v56  ;;  %v1400_v30 = vmul.f32 %v1363_v23, %v1320_v54  ;;  %v1386_v25 = vmul.f32 %v1347_v51, %v1306_v9  ;;  %v1399_v29 = vmul.f32 %v3700_v18, %v1319_v34 }
 0x1d9   :  { %v1324_v40 = vmul.f32 0.0625, %v1285_v12  ;;  %v1389_v11 = vmul.f32 %v3687_v41, %v1309_v48  ;;  %v1367_v1 = vrot.slane %v3680_v0, %v1366_v17  ;;  %v1323_v26 = vmul.f32 0.0625, %v1282_v6 }
 0x1da   :  { %1464 = vperm.xlu1 %1812, %v1380_v22   ;;  %1473 = vperm.xlu0 %1811, %v1383_v55   ;;  %v1390_v21 = vmul.f32 %v3687_v41, %v1310_v37  ;;  %v1267_v22 = vpop.xlane.xlu0 %1266  ;;  %v1313_v55 = vmul.f32 0.0625, %v3668_v5  ;;  %v1314_v63 = vmul.f32 0.0625, %v3670_v33  ;;  %v1317_v41 = vmul.f32 0.0625, %v3672_v16 }
 0x1db   :  { %v1404_v39 = vmul.f32 %v1367_v1, %v1324_v40  ;;  %v1294_v35 = vpop.xlane.xlu1 %1293  ;;  %v1403_v46 = vmul.f32 %v1363_v23, %v1323_v26  ;;  %v1318_v51 = vmul.f32 0.0625, %v1267_v22  ;;  %v1802_v8 = vpack.c.bf16 %v1409_v4, %v1408_v31 }
 0x1dc   :  { %v1327_v42 = vmul.f32 0.0625, %v1294_v35  ;;  %v1393_v62 = vmul.f32 %v3694_v36, %v1313_v55  ;;  %v1397_v5 = vmul.f32 %v3700_v18, %v1317_v41  ;;  %v1962_v61 = vmov 0.0  }
 0x1dd   :  { %v1398_v3 = vmul.f32 %v3700_v18, %v1318_v51  ;;  %v1410_v18 = vld [vmem:[%s3813_s3 + $0x10] sm:$0xff]  ;;  %1798 = vmatprep.mubr.msk.f32.mxu0 %vm1961_vm1, %v1962_v61  ;;  %vm3918_vm1 = vcmask 1047559  }
 0x1de   :  { %1467 = vperm.xlu1 %1812, %v1381_v28   ;;  %1488 = vperm.xlu0 %1811, %v1388_v49   ;;  %v1276_v0 = vpop.xlane.xlu0 %1275  ;;  %v1407_v28 = vmul.f32 %v1367_v1, %v1327_v42  ;;  %v1394_v49 = vmul.f32 %v3694_v36, %v1314_v63 }
 0x1df   :  { %v1321_v43 = vmul.f32 0.0625, %v1276_v0 }
 0x1e2   :  { %1458 = vperm.xlu1 %1812, %v1378_v38   ;;  %1485 = vperm.xlu0 %1811, %v1387_v44   ;;  %v1279_v53 = vpop.xlane.xlu0 %1278  ;;  %v1401_v44 = vmul.f32 %v1363_v23, %v1321_v43 }
 0x1e3   :  { %v1322_v38 = vmul.f32 0.0625, %v1279_v53 }
 0x1e5   :  { %v1402_v15 = vmul.f32 %v1363_v23, %v1322_v38 }
 0x1e6   :  { %1470 = vperm.xlu1 %1812, %v1382_v32   ;;  %1500 = vperm.xlu0 %1811, %v1392_v60   ;;  %v1288_v33 = vpop.xlane.xlu0 %1287  ;;  %v1960_v60 = vmov 0.0|0.0  }
 0x1e7   :  { %v1325_v45 = vmul.f32 0.0625, %v1288_v33  ;;  %1801 = vmatprep.subr.bf16.mxu0 %v1960_v60 }
 0x1e8   :  { %1803 = vmatpush3.bf16.msra.mxu0 %v1802_v8 }
 0x1e9   :  { %v1405_v16 = vmul.f32 %v1367_v1, %v1325_v45  ;;  %1804 = vmatprep.subr.bf16.mxu0 %v1960_v60 }
 0x1ea   :  { %1476 = vperm.xlu1 %1812, %v1384_v24   ;;  %1497 = vperm.xlu0 %1811, %v1391_v52   ;;  %v1291_v36 = vpop.xlane.xlu0 %1290  ;;  %v1411_v24 = vld [vmem:[%s3813_s3 + $0x18] sm:$0xff] }
 0x1eb   :  { %v1326_v50 = vmul.f32 0.0625, %v1291_v36  ;;  %v1805_v52 = vpack.c.bf16 %v1411_v24, %v1410_v18 }
 0x1ed   :  { %v1406_v32 = vmul.f32 %v1367_v1, %v1326_v50  ;;  %1806 = vmatpush3.bf16.msra.mxu0 %v1805_v52 }
 0x1ee   :  { %1479 = vperm.xlu1 %1812, %v1385_v58   ;;  %1512 = vperm.xlu0 %1811, %v1396_v19  }
 0x1f2   :  { %1461 = vperm.xlu1 %1812, %v1379_v59   ;;  %1509 = vperm.xlu0 %1811, %v1395_v57  }
 0x1f6   :  { %1482 = vperm.xlu1 %1812, %v1386_v25   ;;  %1524 = vperm.xlu0 %1811, %v1400_v30  }
 0x1fa   :  { %1491 = vperm.xlu1 %1812, %v1389_v11   ;;  %1521 = vperm.xlu0 %1811, %v1399_v29  }
 0x1fe   :  { %1494 = vperm.xlu1 %1812, %v1390_v21   ;;  %1536 = vperm.xlu0 %1811, %v1404_v39  }
 0x202   :  { %1503 = vperm.xlu1 %1812, %v1393_v62   ;;  %1533 = vperm.xlu0 %1811, %v1403_v46  }
 0x206   :  { %1506 = vperm.xlu1 %1812, %v1394_v49   ;;  %1545 = vperm.xlu0 %1811, %v1407_v28  }
 0x20a   :  { %1515 = vperm.xlu1 %1812, %v1397_v5  }
 0x20e   :  { %1518 = vperm.xlu1 %1812, %v1398_v3  }
 0x212   :  { %1527 = vperm.xlu1 %1812, %v1401_v44  }
 0x216   :  { %1530 = vperm.xlu1 %1812, %v1402_v15  }
 0x21a   :  { %1539 = vperm.xlu1 %1812, %v1405_v16  }
 0x21e   :  { %1542 = vperm.xlu1 %1812, %v1406_v32  }
 0x255   :  { %v1456_v20 = vpop.permute.xlu1 %1455  ;;  %v1453_v2 = vpop.permute.xlu0 %1452 }
 0x256   :  { %v1554_v26 = vrot.slane %v1456_v20, %v2375_v10  ;;  %v1550_v21 = vrot.slane %v1453_v2, %v2372_v7 }
 0x258   :  { %v1555_v63 = vsel %vm481_vm6, %v1554_v26, %v1550_v21 }
 0x259   :  { %v1465_v47 = vpop.permute.xlu1 %1464  ;;  %v1474_v58 = vpop.permute.xlu0 %1473 }
 0x25a   :  { %v1569_v46 = vrot.slane %v1465_v47, %v2372_v7  ;;  %v1583_v0 = vrot.slane %v1474_v58, %v2388_v14 }
 0x25d   :  { %v1468_v19 = vpop.permute.xlu1 %1467  ;;  %v1489_v27 = vpop.permute.xlu0 %1488 }
 0x25e   :  { %v1573_v22 = vrot.slane %v1468_v19, %v2375_v10  ;;  %v1607_v28 = vrot.slane %v1489_v27, %v2372_v7 }
 0x260   :  { %v1574_v41 = vsel %vm481_vm6, %v1573_v22, %v1569_v46 }
 0x261   :  { %v1459_v56 = vpop.permute.xlu1 %1458  ;;  %v3737_v54 = vpop.permute.xlu0 %1485 }
 0x262   :  { %v1559_v35 = vrot.slane %v1459_v56, %v2385_v13  ;;  %v1602_v51 = vrot.slane %v3737_v54, %v2388_v14 }
 0x264   :  { %v1560_v43 = vsel %vm488_vm12, %v1559_v35, %v1555_v63 }
 0x265   :  { %v1471_v23 = vpop.permute.xlu1 %1470  ;;  %v1501_v57 = vpop.permute.xlu0 %1500 }
 0x266   :  { %v1578_v42 = vrot.slane %v1471_v23, %v2385_v13  ;;  %v1626_v50 = vrot.slane %v1501_v57, %v2372_v7 }
 0x268   :  { %v1579_v44 = vsel %vm488_vm12, %v1578_v42, %v1574_v41 }
 0x269   :  { %v1477_v59 = vpop.permute.xlu1 %1476  ;;  %v1498_v30 = vpop.permute.xlu0 %1497  ;;  %v1584_v61 = vsel %vm3893_vm10, %v1583_v0, %v1579_v44  ;;  %vm3919_vm10 = vcmask 261120  }
 0x26a   :  { %v1588_v3 = vrot.slane %v1477_v59, %v2372_v7  ;;  %v1621_v58 = vrot.slane %v1498_v30, %v2388_v14 }
 0x26d   :  { %v1480_v12 = vpop.permute.xlu1 %1479  ;;  %v1513_v25 = vpop.permute.xlu0 %1512 }
 0x26e   :  { %v1592_v49 = vrot.slane %v1480_v12, %v2375_v10  ;;  %v1645_v8 = vrot.slane %v1513_v25, %v2372_v7 }
 0x270   :  { %v1593_v32 = vsel %vm481_vm6, %v1592_v49, %v1588_v3 }
 0x271   :  { %v1462_v9 = vpop.permute.xlu1 %1461  ;;  %v1510_v6 = vpop.permute.xlu0 %1509 }
 0x272   :  { %v1564_v15 = vrot.slane %v1462_v9, %v2388_v14  ;;  %v1640_v54 = vrot.slane %v1510_v6, %v2388_v14 }
 0x274   :  { %v1565_v19 = vsel %vm3906_vm7, %v1564_v15, %v1560_v43 }
 0x275   :  { %v1483_v34 = vpop.permute.xlu1 %1482  ;;  %v1525_v40 = vpop.permute.xlu0 %1524 }
 0x276   :  { %v1597_v5 = vrot.slane %v1483_v34, %v2385_v13  ;;  %v1664_v20 = vrot.slane %v1525_v40, %v2372_v7 }
 0x278   :  { %v1598_v18 = vsel %vm488_vm12, %v1597_v5, %v1593_v32 }
 0x279   :  { %v1492_v48 = vpop.permute.xlu1 %1491  ;;  %v1522_v1 = vpop.permute.xlu0 %1521  ;;  %v1603_v59 = vsel %vm3907_vm2, %v1602_v51, %v1598_v18 }
 0x27a   :  { %v1611_v53 = vrot.slane %v1492_v48, %v2375_v10  ;;  %v1659_v9 = vrot.slane %v1522_v1, %v2388_v14  ;;  %v1699_v48 = vsel %vm3909_vm8, %v1584_v61, %v1565_v19 }
 0x27b   :  { %v1700_v40 = vsel %vm632_vm3, %v1603_v59, %v1699_v48  ;;  %vm3915_vm3 = vcmask 1045509  }
 0x27c   :  { %v1612_v24 = vsel %vm481_vm6, %v1611_v53, %v1607_v28 }
 0x27d   :  { %v1495_v17 = vpop.permute.xlu1 %1494  ;;  %v1537_v55 = vpop.permute.xlu0 %1536 }
 0x27e   :  { %v1616_v33 = vrot.slane %v1495_v17, %v2385_v13 }
 0x280   :  { %v1617_v2 = vsel %vm488_vm12, %v1616_v33, %v1612_v24 }
 0x281   :  { %v1504_v29 = vpop.permute.xlu1 %1503  ;;  %v1534_v60 = vpop.permute.xlu0 %1533  ;;  %v1622_v34 = vsel %vm3908_vm5, %v1621_v58, %v1617_v2 }
 0x282   :  { %v1630_v38 = vrot.slane %v1504_v29, %v2375_v10  ;;  %v1678_v17 = vrot.slane %v1534_v60, %v2388_v14 }
 0x284   :  { %v1631_v47 = vsel %vm481_vm6, %v1630_v38, %v1626_v50 }
 0x285   :  { %v1507_v11 = vpop.permute.xlu1 %1506  ;;  %v1546_v29 = vpop.permute.xlu0 %1545 }
 0x286   :  { %v1635_v45 = vrot.slane %v1507_v11, %v2385_v13  ;;  %v1683_v11 = vrot.slane %v1537_v55, %v2372_v7  ;;  %v1697_v22 = vrot.slane %v1546_v29, %v2388_v14 }
 0x288   :  { %v1636_v27 = vsel %vm488_vm12, %v1635_v45, %v1631_v47 }
 0x289   :  { %v1516_v37 = vpop.permute.xlu1 %1515  ;;  %v1641_v6 = vsel %vm3910_vm9, %v1640_v54, %v1636_v27 }
 0x28a   :  { %v1649_v36 = vrot.slane %v1516_v37, %v2375_v10 }
 0x28c   :  { %v1650_v56 = vsel %vm481_vm6, %v1649_v36, %v1645_v8 }
 0x28d   :  { %v1519_v39 = vpop.permute.xlu1 %1518 }
 0x28e   :  { %v1654_v31 = vrot.slane %v1519_v39, %v2385_v13  ;;  %v1701_v39 = vsel %vm3912_vm4, %v1622_v34, %v1700_v40 }
 0x28f   :  { %v1702_v21 = vsel %vm3914_vm15, %v1641_v6, %v1701_v39 }
 0x290   :  { %v1655_v57 = vsel %vm488_vm12, %v1654_v31, %v1650_v56 }
 0x291   :  { %v1528_v62 = vpop.permute.xlu1 %1527  ;;  %v1660_v37 = vsel %vm3911_vm13, %v1659_v9, %v1655_v57 }
 0x292   :  { %v1668_v4 = vrot.slane %v1528_v62, %v2375_v10  ;;  %v1703_v42 = vsel %vm3915_vm3, %v1660_v37, %v1702_v21 }
 0x294   :  { %v1669_v12 = vsel %vm481_vm6, %v1668_v4, %v1664_v20 }
 0x295   :  { %v1531_v16 = vpop.permute.xlu1 %1530 }
 0x296   :  { %v1673_v52 = vrot.slane %v1531_v16, %v2385_v13 }
 0x298   :  { %v1674_v30 = vsel %vm488_vm12, %v1673_v52, %v1669_v12 }
 0x299   :  { %v1540_v23 = vpop.permute.xlu1 %1539  ;;  %v1679_v26 = vsel %vm3913_vm14, %v1678_v17, %v1674_v30 }
 0x29a   :  { %v1687_v25 = vrot.slane %v1540_v23, %v2375_v10  ;;  %v1704_v55 = vsel %vm3917_vm11, %v1679_v26, %v1703_v42 }
 0x29c   :  { %v1688_v35 = vsel %vm481_vm6, %v1687_v25, %v1683_v11 }
 0x29d   :  { %v1543_v1 = vpop.permute.xlu1 %1542 }
 0x29e   :  { %v1692_v10 = vrot.slane %v1543_v1, %v2385_v13  ;;  %v1783_v13 = vld [vmem:[%s3814_s4] ss:$0 sm:$0xff] }
 0x2a0   :  { %v1693_v46 = vsel %vm488_vm12, %v1692_v10, %v1688_v35 }
 0x2a1   :  { %v1698_v7 = vsel %vm3916_vm0, %v1697_v22, %v1693_v46 }
 0x2a2   :  { %v1705_v62 = vsel %vm3918_vm1, %v1698_v7, %v1704_v55 }
 0x2a3   :  { %1799 = vmatmul.mubr.msk.f32.vlgmr.msra.gmra.mrb[0].mxu0 %vm3919_vm10, %v1705_v62 }
 0x376   :  { %v1774_v63 = vpop.f32.mrb[0].mxu0 }
 0x377   :  { %v1775_v14 = vadd.f32 %v1783_v13, %v1774_v63  ;;  %v1800_v0 = vpop.f32.mrb[1].mxu0 }
 0x379   :  { %1778 = vst [vmem:[%s3815_s5] sm:$0xff] %v1775_v14 }

</bundles_post_ra>
